<compile_context>
chip_gen: v7x
topology: tpu7x:2x2x1
jax: 0.10.0
libtpu: 0.0.40
codegen_flags: <defaults>
</compile_context>

<pallas_src>
import jax
import jax.numpy as jnp
from jax.experimental import pallas as pl
from jax.experimental.pallas import tpu as pltpu  # noqa: F401  (TPU backend)

# ---- problem sizes (small, consistent with the module) ----
M, L, DIM = 2, 8, 32          # batch, seq len, model dim
HEAD, ADIM = 8, 16            # heads (fixed to 8 in the module), per-head dim
HDIM = HEAD * ADIM            # 128
R = M * L                     # 16 flattened activation rows
SROWS = HEAD * R              # 128 stacked (head, batch, pos) attention rows
FF_HIDE = 2048                # FeedForward default hide_dim
LN_EPS = 1e-5
NEG_INF = -1e30               # numerically-safe stand-in for -inf in masked_fill
SCALE = ADIM ** -0.5          # attention scale (folded into wq/bq at param-prep time)


def _layernorm(x, w, b):
    mu = jnp.mean(x, axis=-1, keepdims=True)
    var = jnp.mean((x - mu) ** 2, axis=-1, keepdims=True)
    return (x - mu) * jax.lax.rsqrt(var + LN_EPS) * w + b


def encoder_layer_kernel(x_ref, bias_ref,
                         wq_ref, bq_ref, wk_ref, bk_ref, wv_ref, bv_ref,
                         wfc_ref, bfc_ref, ln1w_ref, ln1b_ref,
                         w1_ref, b1_ref, w2_ref, b2_ref, ln2w_ref, ln2b_ref,
                         o_ref):
    x = x_ref[...]                                                   # (R, DIM)

    # --- QKV projections: all M*L rows at once (f32 MXU).  wq/bq are pre-scaled
    #     by ADIM**-0.5 so no per-score multiply is needed later. ---
    q = jnp.dot(x, wq_ref[...], preferred_element_type=jnp.float32) + bq_ref[...]
    k = jnp.dot(x, wk_ref[...], preferred_element_type=jnp.float32) + bk_ref[...]
    v = jnp.dot(x, wv_ref[...], preferred_element_type=jnp.float32) + bv_ref[...]

    # --- stack heads onto the sublane axis: (R, HEAD*ADIM) -> (HEAD*R, ADIM) ---
    def stack_heads(t):
        return jnp.concatenate(
            [t[:, h * ADIM:(h + 1) * ADIM] for h in range(HEAD)], axis=0)

    qs, ks, vs = stack_heads(q), stack_heads(k), stack_heads(v)      # (SROWS, ADIM)

    # --- fused attention scores for every (head, batch) pair: one MXU matmul ---
    s = jnp.dot(qs, ks.T, preferred_element_type=jnp.float32)        # (SROWS, SROWS)
    # Single additive bias tile (padding mask + -inf on cross-(head,batch) blocks),
    # fully precomputed by the wrapper: the whole masking path is one add.
    s = s + bias_ref[...].astype(jnp.float32)

    # --- single softmax pass over the whole stacked (128,128) tile ---
    s = s - jnp.max(s, axis=-1, keepdims=True)
    p = jnp.exp(s)
    p = p * pl.reciprocal(jnp.sum(p, axis=-1, keepdims=True), approx=True)

    # --- P @ V (one MXU matmul), then unstack heads back onto lanes (head-major) ---
    o_s = jnp.dot(p, vs, preferred_element_type=jnp.float32)         # (SROWS, ADIM)
    att = jnp.concatenate(
        [o_s[h * R:(h + 1) * R, :] for h in range(HEAD)], axis=1)    # (R, HDIM)

    # --- output projection + residual + LayerNorm (the '(d n)' rearrange of the
    #     reference is absorbed into a column permutation of wfc in the wrapper) ---
    mha = jnp.dot(att, wfc_ref[...], preferred_element_type=jnp.float32) + bfc_ref[...]
    # TODO(synk): dropout is identity (eval mode); stochastic dropout not implemented.
    y = _layernorm(mha + x, ln1w_ref[...], ln1b_ref[...])

    # --- FeedForward: bf16 weights/activations into the MXU, f32 accumulation ---
    h1 = jnp.dot(y.astype(jnp.bfloat16), w1_ref[...],
                 preferred_element_type=jnp.float32) + b1_ref[...]
    h1 = jnp.maximum(h1, 0.0)
    h2 = jnp.dot(h1.astype(jnp.bfloat16), w2_ref[...],
                 preferred_element_type=jnp.float32) + b2_ref[...]
    out = _layernorm(h2 + y, ln2w_ref[...], ln2b_ref[...])

    o_ref[...] = out.astype(o_ref.dtype)


def _attention_bias(mask_bool):
    """(M, L, L) bool mask (True = attend) -> (SROWS, SROWS) additive bf16 bias for the
    stacked (head, batch, pos) score tile: 0 where attending within the same
    (head, batch) block, NEG_INF everywhere else (mask-off and cross-block)."""
    idx = jnp.arange(SROWS)
    h_i = idx // R                       # head of stacked row/col
    m_i = (idx % R) // L                 # batch of stacked row/col
    l_i = idx % L                        # position of stacked row/col
    same_block = (h_i[:, None] == h_i[None, :]) & (m_i[:, None] == m_i[None, :])
    attend = mask_bool[m_i[:, None], l_i[:, None], l_i[None, :]]     # (SROWS, SROWS)
    return jnp.where(same_block & attend, 0.0, NEG_INF).astype(jnp.bfloat16)


def encoder_layer(x, mask_bool, kparams):
    """x: (M, L, DIM) f32; mask_bool: (M, L, L) bool (True = attend)."""
    x_flat = x.reshape(R, DIM)
    bias_full = _attention_bias(mask_bool)                           # (SROWS, SROWS) bf16

    names = ["wq", "bq", "wk", "bk", "wv", "bv", "wfc", "bfc", "ln1w", "ln1b",
             "w1", "b1", "w2", "b2", "ln2w", "ln2b"]
    weight_args = [kparams[n] for n in names]

    out_flat = pl.pallas_call(
        encoder_layer_kernel,
        out_shape=jax.ShapeDtypeStruct((R, DIM), jnp.float32),
        # No grid: one invocation; every operand is a single whole-array VMEM block
        # (total <1 MiB incl. layout padding), DMA'd exactly once.
    )(x_flat, bias_full, *weight_args)
    return out_flat.reshape(M, L, DIM)


# ---------------- parameter init (deterministic, PyTorch-like) ----------------
def init_params(key):
    def linear(key, out_f, in_f):
        kw, kb = jax.random.split(key)
        bound = 1.0 / (in_f ** 0.5)
        w = jax.random.uniform(kw, (out_f, in_f), jnp.float32, -bound, bound)
        b = jax.random.uniform(kb, (out_f,), jnp.float32, -bound, bound)
        return w, b

    ks = jax.random.split(key, 6)
    raw = {}
    raw["wq"], raw["bq"] = linear(ks[0], HDIM, DIM)
    raw["wk"], raw["bk"] = linear(ks[1], HDIM, DIM)
    raw["wv"], raw["bv"] = linear(ks[2], HDIM, DIM)
    raw["wfc"], raw["bfc"] = linear(ks[3], DIM, HDIM)
    raw["w1"], raw["b1"] = linear(ks[4], FF_HIDE, DIM)
    raw["w2"], raw["b2"] = linear(ks[5], DIM, FF_HIDE)
    raw["ln1w"], raw["ln1b"] = jnp.ones((DIM,), jnp.float32), jnp.zeros((DIM,), jnp.float32)
    raw["ln2w"], raw["ln2b"] = jnp.ones((DIM,), jnp.float32), jnp.zeros((DIM,), jnp.float32)
    return raw


def kernel_params(raw):
    """Pre-transpose weights to (in, out); fold the attention scale into wq/bq; absorb the
    '(d n)' rearrange into wfc; reshape 1-D vectors to (1, N); store the big FFN weights
    in bf16 (f32 accumulate)."""
    # fc consumes index j = d*HEAD + h; kernel produces index j' = h*ADIM + d.
    wfc_perm = raw["wfc"].reshape(DIM, ADIM, HEAD).transpose(0, 2, 1).reshape(DIM, HDIM)
    return {
        "wq": raw["wq"].T * SCALE, "bq": raw["bq"].reshape(1, HDIM) * SCALE,
        "wk": raw["wk"].T, "bk": raw["bk"].reshape(1, HDIM),
        "wv": raw["wv"].T, "bv": raw["bv"].reshape(1, HDIM),
        "wfc": wfc_perm.T, "bfc": raw["bfc"].reshape(1, DIM),
        "ln1w": raw["ln1w"].reshape(1, DIM), "ln1b": raw["ln1b"].reshape(1, DIM),
        "w1": raw["w1"].T.astype(jnp.bfloat16), "b1": raw["b1"].reshape(1, FF_HIDE),
        "w2": raw["w2"].T.astype(jnp.bfloat16), "b2": raw["b2"].reshape(1, DIM),
        "ln2w": raw["ln2w"].reshape(1, DIM), "ln2b": raw["ln2b"].reshape(1, DIM),
    }


# ---------------- pure-JAX f32 reference (mirrors the PyTorch forward) ----------------
def reference(x, mask_bool, raw):
    lin = lambda a, w, b: a @ w.T + b
    Q = lin(x, raw["wq"], raw["bq"]).reshape(M, L, HEAD, ADIM).transpose(0, 2, 1, 3)
    K = lin(x, raw["wk"], raw["bk"]).reshape(M, L, HEAD, ADIM).transpose(0, 2, 1, 3)
    V = lin(x, raw["wv"], raw["bv"]).reshape(M, L, HEAD, ADIM).transpose(0, 2, 1, 3)
    attn = jnp.einsum("mnld,mnkd->mnlk", Q, K) * (ADIM ** -0.5)
    attn = jnp.where(mask_bool[:, None, :, :], attn, NEG_INF)
    attn = jax.nn.softmax(attn, axis=-1)
    o = jnp.einsum("mnlk,mnkd->mnld", attn, V)
    o = o.transpose(0, 2, 3, 1).reshape(M, L, ADIM * HEAD)        # 'm n l d -> m l (d n)'
    mha = lin(o, raw["wfc"], raw["bfc"]) + x
    mu = mha.mean(-1, keepdims=True); var = ((mha - mu) ** 2).mean(-1, keepdims=True)
    y = (mha - mu) / jnp.sqrt(var + LN_EPS) * raw["ln1w"] + raw["ln1b"]
    h = jnp.maximum(lin(y, raw["w1"], raw["b1"]), 0.0)
    z = lin(h, raw["w2"], raw["b2"]) + y
    mu = z.mean(-1, keepdims=True); var = ((z - mu) ** 2).mean(-1, keepdims=True)
    return (z - mu) / jnp.sqrt(var + LN_EPS) * raw["ln2w"] + raw["ln2b"]


if __name__ == "__main__":
    key = jax.random.PRNGKey(0)
    kx, kp = jax.random.split(key)

    x = jax.random.normal(kx, (M, L, DIM), jnp.float32)
    # padding-style mask: batch 0 attends to all 8 positions, batch 1 to first 5
    lengths = jnp.array([L, 5], jnp.int32)
    mask_bool = jnp.broadcast_to(
        jnp.arange(L)[None, None, :] < lengths[:, None, None], (M, L, L))

    raw = init_params(kp)
    kparams = kernel_params(raw)

    out = encoder_layer(x, mask_bool, kparams)
    out = jax.block_until_ready(out)

    ref = reference(x, mask_bool, raw)
    assert out.shape == (M, L, DIM)
    # bf16 FFN weights + approx reciprocal => compare against the pure-f32 reference with a
    # correspondingly relaxed (but still meaningful) tolerance.
    err = jnp.max(jnp.abs(out - ref))
    assert jnp.allclose(out, ref, atol=2e-2, rtol=2e-2), f"max abs err = {err}"

    print("KERNEL_OK")
</pallas_src>

<mosaic_0001>
module attributes {stable_mosaic.version = 11 : i64} {
  func.func @encoder_layer_kernel(%arg0: memref<16x32xf32, #tpu.memory_space<vmem>>, %arg1: memref<128x128xbf16, #tpu.memory_space<vmem>>, %arg2: memref<32x128xf32, #tpu.memory_space<vmem>>, %arg3: memref<1x128xf32, #tpu.memory_space<vmem>>, %arg4: memref<32x128xf32, #tpu.memory_space<vmem>>, %arg5: memref<1x128xf32, #tpu.memory_space<vmem>>, %arg6: memref<32x128xf32, #tpu.memory_space<vmem>>, %arg7: memref<1x128xf32, #tpu.memory_space<vmem>>, %arg8: memref<128x32xf32, #tpu.memory_space<vmem>>, %arg9: memref<1x32xf32, #tpu.memory_space<vmem>>, %arg10: memref<1x32xf32, #tpu.memory_space<vmem>>, %arg11: memref<1x32xf32, #tpu.memory_space<vmem>>, %arg12: memref<32x2048xbf16, #tpu.memory_space<vmem>>, %arg13: memref<1x2048xf32, #tpu.memory_space<vmem>>, %arg14: memref<2048x32xbf16, #tpu.memory_space<vmem>>, %arg15: memref<1x32xf32, #tpu.memory_space<vmem>>, %arg16: memref<1x32xf32, #tpu.memory_space<vmem>>, %arg17: memref<1x32xf32, #tpu.memory_space<vmem>>, %arg18: memref<16x32xf32, #tpu.memory_space<vmem>>) attributes {dimension_semantics = [], scalar_prefetch = 0 : i64, scratch_operands = 0 : i64, tpu.core_type = #tpu.core_type<tc>} {
    %c0 = arith.constant 0 : index
    %c0_0 = arith.constant 0 : index
    %0 = vector.load %arg0[%c0, %c0_0] : memref<16x32xf32, #tpu.memory_space<vmem>>, vector<16x32xf32>
    %c0_1 = arith.constant 0 : index
    %c0_2 = arith.constant 0 : index
    %1 = vector.load %arg2[%c0_1, %c0_2] : memref<32x128xf32, #tpu.memory_space<vmem>>, vector<32x128xf32>
    %cst = arith.constant dense<0.000000e+00> : vector<16x128xf32>
    %2 = tpu.matmul %0, %1, %cst {dimension_numbers = #tpu.dot_dimension_numbers<[1], [0], [0], [1], [0, 0, 1, 1], [], []>} : vector<16x32xf32>, vector<32x128xf32>, vector<16x128xf32> -> vector<16x128xf32>
    %c0_3 = arith.constant 0 : index
    %c0_4 = arith.constant 0 : index
    %3 = vector.load %arg3[%c0_3, %c0_4] : memref<1x128xf32, #tpu.memory_space<vmem>>, vector<1x128xf32>
    %4 = vector.broadcast %3 : vector<1x128xf32> to vector<16x128xf32>
    %5 = arith.addf %2, %4 : vector<16x128xf32>
    %c0_5 = arith.constant 0 : index
    %c0_6 = arith.constant 0 : index
    %6 = vector.load %arg4[%c0_5, %c0_6] : memref<32x128xf32, #tpu.memory_space<vmem>>, vector<32x128xf32>
    %cst_7 = arith.constant dense<0.000000e+00> : vector<16x128xf32>
    %7 = tpu.matmul %0, %6, %cst_7 {dimension_numbers = #tpu.dot_dimension_numbers<[1], [0], [0], [1], [0, 0, 1, 1], [], []>} : vector<16x32xf32>, vector<32x128xf32>, vector<16x128xf32> -> vector<16x128xf32>
    %c0_8 = arith.constant 0 : index
    %c0_9 = arith.constant 0 : index
    %8 = vector.load %arg5[%c0_8, %c0_9] : memref<1x128xf32, #tpu.memory_space<vmem>>, vector<1x128xf32>
    %9 = vector.broadcast %8 : vector<1x128xf32> to vector<16x128xf32>
    %10 = arith.addf %7, %9 : vector<16x128xf32>
    %c0_10 = arith.constant 0 : index
    %c0_11 = arith.constant 0 : index
    %11 = vector.load %arg6[%c0_10, %c0_11] : memref<32x128xf32, #tpu.memory_space<vmem>>, vector<32x128xf32>
    %cst_12 = arith.constant dense<0.000000e+00> : vector<16x128xf32>
    %12 = tpu.matmul %0, %11, %cst_12 {dimension_numbers = #tpu.dot_dimension_numbers<[1], [0], [0], [1], [0, 0, 1, 1], [], []>} : vector<16x32xf32>, vector<32x128xf32>, vector<16x128xf32> -> vector<16x128xf32>
    %c0_13 = arith.constant 0 : index
    %c0_14 = arith.constant 0 : index
    %13 = vector.load %arg7[%c0_13, %c0_14] : memref<1x128xf32, #tpu.memory_space<vmem>>, vector<1x128xf32>
    %14 = vector.broadcast %13 : vector<1x128xf32> to vector<16x128xf32>
    %15 = arith.addf %12, %14 : vector<16x128xf32>
    %16 = vector.extract_strided_slice %5 {offsets = [0, 0], sizes = [16, 16], strides = [1, 1]} : vector<16x128xf32> to vector<16x16xf32>
    %17 = vector.extract_strided_slice %5 {offsets = [0, 16], sizes = [16, 16], strides = [1, 1]} : vector<16x128xf32> to vector<16x16xf32>
    %18 = vector.extract_strided_slice %5 {offsets = [0, 32], sizes = [16, 16], strides = [1, 1]} : vector<16x128xf32> to vector<16x16xf32>
    %19 = vector.extract_strided_slice %5 {offsets = [0, 48], sizes = [16, 16], strides = [1, 1]} : vector<16x128xf32> to vector<16x16xf32>
    %20 = vector.extract_strided_slice %5 {offsets = [0, 64], sizes = [16, 16], strides = [1, 1]} : vector<16x128xf32> to vector<16x16xf32>
    %21 = vector.extract_strided_slice %5 {offsets = [0, 80], sizes = [16, 16], strides = [1, 1]} : vector<16x128xf32> to vector<16x16xf32>
    %22 = vector.extract_strided_slice %5 {offsets = [0, 96], sizes = [16, 16], strides = [1, 1]} : vector<16x128xf32> to vector<16x16xf32>
    %23 = vector.extract_strided_slice %5 {offsets = [0, 112], sizes = [16, 16], strides = [1, 1]} : vector<16x128xf32> to vector<16x16xf32>
    %24 = tpu.concatenate %16, %17, %18, %19, %20, %21, %22, %23 in 0 : vector<16x16xf32>, vector<16x16xf32>, vector<16x16xf32>, vector<16x16xf32>, vector<16x16xf32>, vector<16x16xf32>, vector<16x16xf32>, vector<16x16xf32> -> vector<128x16xf32>
    %25 = vector.extract_strided_slice %10 {offsets = [0, 0], sizes = [16, 16], strides = [1, 1]} : vector<16x128xf32> to vector<16x16xf32>
    %26 = vector.extract_strided_slice %10 {offsets = [0, 16], sizes = [16, 16], strides = [1, 1]} : vector<16x128xf32> to vector<16x16xf32>
    %27 = vector.extract_strided_slice %10 {offsets = [0, 32], sizes = [16, 16], strides = [1, 1]} : vector<16x128xf32> to vector<16x16xf32>
    %28 = vector.extract_strided_slice %10 {offsets = [0, 48], sizes = [16, 16], strides = [1, 1]} : vector<16x128xf32> to vector<16x16xf32>
    %29 = vector.extract_strided_slice %10 {offsets = [0, 64], sizes = [16, 16], strides = [1, 1]} : vector<16x128xf32> to vector<16x16xf32>
    %30 = vector.extract_strided_slice %10 {offsets = [0, 80], sizes = [16, 16], strides = [1, 1]} : vector<16x128xf32> to vector<16x16xf32>
    %31 = vector.extract_strided_slice %10 {offsets = [0, 96], sizes = [16, 16], strides = [1, 1]} : vector<16x128xf32> to vector<16x16xf32>
    %32 = vector.extract_strided_slice %10 {offsets = [0, 112], sizes = [16, 16], strides = [1, 1]} : vector<16x128xf32> to vector<16x16xf32>
    %33 = tpu.concatenate %25, %26, %27, %28, %29, %30, %31, %32 in 0 : vector<16x16xf32>, vector<16x16xf32>, vector<16x16xf32>, vector<16x16xf32>, vector<16x16xf32>, vector<16x16xf32>, vector<16x16xf32>, vector<16x16xf32> -> vector<128x16xf32>
    %34 = vector.extract_strided_slice %15 {offsets = [0, 0], sizes = [16, 16], strides = [1, 1]} : vector<16x128xf32> to vector<16x16xf32>
    %35 = vector.extract_strided_slice %15 {offsets = [0, 16], sizes = [16, 16], strides = [1, 1]} : vector<16x128xf32> to vector<16x16xf32>
    %36 = vector.extract_strided_slice %15 {offsets = [0, 32], sizes = [16, 16], strides = [1, 1]} : vector<16x128xf32> to vector<16x16xf32>
    %37 = vector.extract_strided_slice %15 {offsets = [0, 48], sizes = [16, 16], strides = [1, 1]} : vector<16x128xf32> to vector<16x16xf32>
    %38 = vector.extract_strided_slice %15 {offsets = [0, 64], sizes = [16, 16], strides = [1, 1]} : vector<16x128xf32> to vector<16x16xf32>
    %39 = vector.extract_strided_slice %15 {offsets = [0, 80], sizes = [16, 16], strides = [1, 1]} : vector<16x128xf32> to vector<16x16xf32>
    %40 = vector.extract_strided_slice %15 {offsets = [0, 96], sizes = [16, 16], strides = [1, 1]} : vector<16x128xf32> to vector<16x16xf32>
    %41 = vector.extract_strided_slice %15 {offsets = [0, 112], sizes = [16, 16], strides = [1, 1]} : vector<16x128xf32> to vector<16x16xf32>
    %42 = tpu.concatenate %34, %35, %36, %37, %38, %39, %40, %41 in 0 : vector<16x16xf32>, vector<16x16xf32>, vector<16x16xf32>, vector<16x16xf32>, vector<16x16xf32>, vector<16x16xf32>, vector<16x16xf32>, vector<16x16xf32> -> vector<128x16xf32>
    %43 = tpu.transpose %33, [1, 0] : vector<128x16xf32> -> vector<16x128xf32>
    %cst_15 = arith.constant dense<0.000000e+00> : vector<128x128xf32>
    %44 = tpu.matmul %24, %43, %cst_15 {dimension_numbers = #tpu.dot_dimension_numbers<[1], [0], [0], [1], [0, 0, 1, 1], [], []>} : vector<128x16xf32>, vector<16x128xf32>, vector<128x128xf32> -> vector<128x128xf32>
    %c0_16 = arith.constant 0 : index
    %c0_17 = arith.constant 0 : index
    %45 = vector.load %arg1[%c0_16, %c0_17] : memref<128x128xbf16, #tpu.memory_space<vmem>>, vector<128x128xbf16>
    %46 = arith.extf %45 : vector<128x128xbf16> to vector<128x128xf32>
    %47 = arith.addf %44, %46 : vector<128x128xf32>
    %cst_18 = arith.constant dense<0xFF800000> : vector<128xf32>
    %48 = vector.multi_reduction <maximumf>, %47, %cst_18 [1] : vector<128x128xf32> to vector<128xf32>
    %49 = vector.shape_cast %48 : vector<128xf32> to vector<128x1xf32>
    %50 = vector.broadcast %49 : vector<128x1xf32> to vector<128x128xf32>
    %51 = arith.subf %47, %50 : vector<128x128xf32>
    %52 = math.exp %51 : vector<128x128xf32>
    %cst_19 = arith.constant dense<0.000000e+00> : vector<128xf32>
    %53 = vector.multi_reduction <add>, %52, %cst_19 [1] : vector<128x128xf32> to vector<128xf32>
    %54 = vector.shape_cast %53 : vector<128xf32> to vector<128x1xf32>
    %55 = tpu.reciprocal %54 {approx = true} : vector<128x1xf32> -> vector<128x1xf32>
    %56 = vector.broadcast %55 : vector<128x1xf32> to vector<128x128xf32>
    %57 = arith.mulf %52, %56 : vector<128x128xf32>
    %cst_20 = arith.constant dense<0.000000e+00> : vector<128x16xf32>
    %58 = tpu.matmul %57, %42, %cst_20 {dimension_numbers = #tpu.dot_dimension_numbers<[1], [0], [0], [1], [0, 0, 1, 1], [], []>} : vector<128x128xf32>, vector<128x16xf32>, vector<128x16xf32> -> vector<128x16xf32>
    %59 = vector.extract_strided_slice %58 {offsets = [0, 0], sizes = [16, 16], strides = [1, 1]} : vector<128x16xf32> to vector<16x16xf32>
    %60 = vector.extract_strided_slice %58 {offsets = [16, 0], sizes = [16, 16], strides = [1, 1]} : vector<128x16xf32> to vector<16x16xf32>
    %61 = vector.extract_strided_slice %58 {offsets = [32, 0], sizes = [16, 16], strides = [1, 1]} : vector<128x16xf32> to vector<16x16xf32>
    %62 = vector.extract_strided_slice %58 {offsets = [48, 0], sizes = [16, 16], strides = [1, 1]} : vector<128x16xf32> to vector<16x16xf32>
    %63 = vector.extract_strided_slice %58 {offsets = [64, 0], sizes = [16, 16], strides = [1, 1]} : vector<128x16xf32> to vector<16x16xf32>
    %64 = vector.extract_strided_slice %58 {offsets = [80, 0], sizes = [16, 16], strides = [1, 1]} : vector<128x16xf32> to vector<16x16xf32>
    %65 = vector.extract_strided_slice %58 {offsets = [96, 0], sizes = [16, 16], strides = [1, 1]} : vector<128x16xf32> to vector<16x16xf32>
    %66 = vector.extract_strided_slice %58 {offsets = [112, 0], sizes = [16, 16], strides = [1, 1]} : vector<128x16xf32> to vector<16x16xf32>
    %67 = tpu.concatenate %59, %60, %61, %62, %63, %64, %65, %66 in 1 : vector<16x16xf32>, vector<16x16xf32>, vector<16x16xf32>, vector<16x16xf32>, vector<16x16xf32>, vector<16x16xf32>, vector<16x16xf32>, vector<16x16xf32> -> vector<16x128xf32>
    %c0_21 = arith.constant 0 : index
    %c0_22 = arith.constant 0 : index
    %68 = vector.load %arg8[%c0_21, %c0_22] : memref<128x32xf32, #tpu.memory_space<vmem>>, vector<128x32xf32>
    %cst_23 = arith.constant dense<0.000000e+00> : vector<16x32xf32>
    %69 = tpu.matmul %67, %68, %cst_23 {dimension_numbers = #tpu.dot_dimension_numbers<[1], [0], [0], [1], [0, 0, 1, 1], [], []>} : vector<16x128xf32>, vector<128x32xf32>, vector<16x32xf32> -> vector<16x32xf32>
    %c0_24 = arith.constant 0 : index
    %c0_25 = arith.constant 0 : index
    %70 = vector.load %arg9[%c0_24, %c0_25] : memref<1x32xf32, #tpu.memory_space<vmem>>, vector<1x32xf32>
    %71 = vector.broadcast %70 : vector<1x32xf32> to vector<16x32xf32>
    %72 = arith.addf %69, %71 : vector<16x32xf32>
    %73 = arith.addf %72, %0 : vector<16x32xf32>
    %c0_26 = arith.constant 0 : index
    %c0_27 = arith.constant 0 : index
    %74 = vector.load %arg10[%c0_26, %c0_27] : memref<1x32xf32, #tpu.memory_space<vmem>>, vector<1x32xf32>
    %c0_28 = arith.constant 0 : index
    %c0_29 = arith.constant 0 : index
    %75 = vector.load %arg11[%c0_28, %c0_29] : memref<1x32xf32, #tpu.memory_space<vmem>>, vector<1x32xf32>
    %cst_30 = arith.constant dense<0.000000e+00> : vector<16xf32>
    %76 = vector.multi_reduction <add>, %73, %cst_30 [1] : vector<16x32xf32> to vector<16xf32>
    %77 = vector.shape_cast %76 : vector<16xf32> to vector<16x1xf32>
    %cst_31 = arith.constant 3.200000e+01 : f32
    %78 = vector.broadcast %cst_31 : f32 to vector<16x1xf32>
    %79 = arith.divf %77, %78 : vector<16x1xf32>
    %80 = vector.broadcast %79 : vector<16x1xf32> to vector<16x32xf32>
    %81 = arith.subf %73, %80 : vector<16x32xf32>
    %82 = arith.mulf %81, %81 : vector<16x32xf32>
    %cst_32 = arith.constant dense<0.000000e+00> : vector<16xf32>
    %83 = vector.multi_reduction <add>, %82, %cst_32 [1] : vector<16x32xf32> to vector<16xf32>
    %84 = vector.shape_cast %83 : vector<16xf32> to vector<16x1xf32>
    %cst_33 = arith.constant 3.200000e+01 : f32
    %85 = vector.broadcast %cst_33 : f32 to vector<16x1xf32>
    %86 = arith.divf %84, %85 : vector<16x1xf32>
    %87 = vector.broadcast %79 : vector<16x1xf32> to vector<16x32xf32>
    %88 = arith.subf %73, %87 : vector<16x32xf32>
    %cst_34 = arith.constant 9.99999974E-6 : f32
    %89 = vector.broadcast %cst_34 : f32 to vector<16x1xf32>
    %90 = arith.addf %86, %89 : vector<16x1xf32>
    %91 = math.rsqrt %90 : vector<16x1xf32>
    %92 = vector.broadcast %91 : vector<16x1xf32> to vector<16x32xf32>
    %93 = arith.mulf %88, %92 : vector<16x32xf32>
    %94 = vector.broadcast %74 : vector<1x32xf32> to vector<16x32xf32>
    %95 = arith.mulf %93, %94 : vector<16x32xf32>
    %96 = vector.broadcast %75 : vector<1x32xf32> to vector<16x32xf32>
    %97 = arith.addf %95, %96 : vector<16x32xf32>
    %98 = arith.truncf %97 : vector<16x32xf32> to vector<16x32xbf16>
    %c0_35 = arith.constant 0 : index
    %c0_36 = arith.constant 0 : index
    %99 = vector.load %arg12[%c0_35, %c0_36] : memref<32x2048xbf16, #tpu.memory_space<vmem>>, vector<32x2048xbf16>
    %cst_37 = arith.constant dense<0.000000e+00> : vector<16x2048xf32>
    %100 = tpu.matmul %98, %99, %cst_37 {dimension_numbers = #tpu.dot_dimension_numbers<[1], [0], [0], [1], [0, 0, 1, 1], [], []>} : vector<16x32xbf16>, vector<32x2048xbf16>, vector<16x2048xf32> -> vector<16x2048xf32>
    %c0_38 = arith.constant 0 : index
    %c0_39 = arith.constant 0 : index
    %101 = vector.load %arg13[%c0_38, %c0_39] : memref<1x2048xf32, #tpu.memory_space<vmem>>, vector<1x2048xf32>
    %102 = vector.broadcast %101 : vector<1x2048xf32> to vector<16x2048xf32>
    %103 = arith.addf %100, %102 : vector<16x2048xf32>
    %cst_40 = arith.constant 0.000000e+00 : f32
    %104 = vector.broadcast %cst_40 : f32 to vector<16x2048xf32>
    %105 = arith.maximumf %103, %104 : vector<16x2048xf32>
    %106 = arith.truncf %105 : vector<16x2048xf32> to vector<16x2048xbf16>
    %c0_41 = arith.constant 0 : index
    %c0_42 = arith.constant 0 : index
    %107 = vector.load %arg14[%c0_41, %c0_42] : memref<2048x32xbf16, #tpu.memory_space<vmem>>, vector<2048x32xbf16>
    %cst_43 = arith.constant dense<0.000000e+00> : vector<16x32xf32>
    %108 = tpu.matmul %106, %107, %cst_43 {dimension_numbers = #tpu.dot_dimension_numbers<[1], [0], [0], [1], [0, 0, 1, 1], [], []>} : vector<16x2048xbf16>, vector<2048x32xbf16>, vector<16x32xf32> -> vector<16x32xf32>
    %c0_44 = arith.constant 0 : index
    %c0_45 = arith.constant 0 : index
    %109 = vector.load %arg15[%c0_44, %c0_45] : memref<1x32xf32, #tpu.memory_space<vmem>>, vector<1x32xf32>
    %110 = vector.broadcast %109 : vector<1x32xf32> to vector<16x32xf32>
    %111 = arith.addf %108, %110 : vector<16x32xf32>
    %112 = arith.addf %111, %97 : vector<16x32xf32>
    %c0_46 = arith.constant 0 : index
    %c0_47 = arith.constant 0 : index
    %113 = vector.load %arg16[%c0_46, %c0_47] : memref<1x32xf32, #tpu.memory_space<vmem>>, vector<1x32xf32>
    %c0_48 = arith.constant 0 : index
    %c0_49 = arith.constant 0 : index
    %114 = vector.load %arg17[%c0_48, %c0_49] : memref<1x32xf32, #tpu.memory_space<vmem>>, vector<1x32xf32>
    %cst_50 = arith.constant dense<0.000000e+00> : vector<16xf32>
    %115 = vector.multi_reduction <add>, %112, %cst_50 [1] : vector<16x32xf32> to vector<16xf32>
    %116 = vector.shape_cast %115 : vector<16xf32> to vector<16x1xf32>
    %cst_51 = arith.constant 3.200000e+01 : f32
    %117 = vector.broadcast %cst_51 : f32 to vector<16x1xf32>
    %118 = arith.divf %116, %117 : vector<16x1xf32>
    %119 = vector.broadcast %118 : vector<16x1xf32> to vector<16x32xf32>
    %120 = arith.subf %112, %119 : vector<16x32xf32>
    %121 = arith.mulf %120, %120 : vector<16x32xf32>
    %cst_52 = arith.constant dense<0.000000e+00> : vector<16xf32>
    %122 = vector.multi_reduction <add>, %121, %cst_52 [1] : vector<16x32xf32> to vector<16xf32>
    %123 = vector.shape_cast %122 : vector<16xf32> to vector<16x1xf32>
    %cst_53 = arith.constant 3.200000e+01 : f32
    %124 = vector.broadcast %cst_53 : f32 to vector<16x1xf32>
    %125 = arith.divf %123, %124 : vector<16x1xf32>
    %126 = vector.broadcast %118 : vector<16x1xf32> to vector<16x32xf32>
    %127 = arith.subf %112, %126 : vector<16x32xf32>
    %cst_54 = arith.constant 9.99999974E-6 : f32
    %128 = vector.broadcast %cst_54 : f32 to vector<16x1xf32>
    %129 = arith.addf %125, %128 : vector<16x1xf32>
    %130 = math.rsqrt %129 : vector<16x1xf32>
    %131 = vector.broadcast %130 : vector<16x1xf32> to vector<16x32xf32>
    %132 = arith.mulf %127, %131 : vector<16x32xf32>
    %133 = vector.broadcast %113 : vector<1x32xf32> to vector<16x32xf32>
    %134 = arith.mulf %132, %133 : vector<16x32xf32>
    %135 = vector.broadcast %114 : vector<1x32xf32> to vector<16x32xf32>
    %136 = arith.addf %134, %135 : vector<16x32xf32>
    %c0_55 = arith.constant 0 : index
    %c0_56 = arith.constant 0 : index
    %137 = vector.load %arg18[%c0_55, %c0_56] : memref<16x32xf32, #tpu.memory_space<vmem>>, vector<16x32xf32>
    tpu.vector_store %arg18[%c0_55, %c0_56], %136 {strides = array<i32>} : memref<16x32xf32, #tpu.memory_space<vmem>>, vector<16x32xf32>,
    return
  }
}

</mosaic_0001>

<bundles_post_ra>
// kernel: tpu_custom_call.1
= control target key start
LH: loop header
LB: loop body
LE: loop exit
PB: predicated region body
PF: predicated region fallthrough
CT: control target
= control target key end

     0   :  { %s5593_s0 = inlined_call_operand.vmem [shape: f32[16,32], index: 0, kind: input, shape index: {}]   ;;  %s5594_s1 = inlined_call_operand.vmem [shape: bf16[128,128], index: 1, kind: input, shape index: {}]   ;;  %s5595_s2 = inlined_call_operand.vmem [shape: f32[32,128], index: 2, kind: input, shape index: {}]   ;;  %s5596_s3 = inlined_call_operand.vmem [shape: f32[1,128], index: 3, kind: input, shape index: {}]   ;;  %s5597_s4 = inlined_call_operand.vmem [shape: f32[32,128], index: 4, kind: input, shape index: {}]   ;;  %s5598_s5 = inlined_call_operand.vmem [shape: f32[1,128], index: 5, kind: input, shape index: {}]   ;;  %s5599_s6 = inlined_call_operand.vmem [shape: f32[32,128], index: 6, kind: input, shape index: {}]   ;;  %s5600_s7 = inlined_call_operand.vmem [shape: f32[1,128], index: 7, kind: input, shape index: {}]   ;;  %s5601_s8 = inlined_call_operand.vmem [shape: f32[128,32], index: 8, kind: input, shape index: {}]   ;;  %s5602_s9 = inlined_call_operand.vmem [shape: f32[1,32], index: 9, kind: input, shape index: {}]   ;;  %s5603_s10 = inlined_call_operand.vmem [shape: f32[1,32], index: 10, kind: input, shape index: {}]   ;;  %s5604_s11 = inlined_call_operand.vmem [shape: f32[1,32], index: 11, kind: input, shape index: {}]   ;;  %s5605_s12 = inlined_call_operand.vmem [shape: bf16[32,2048], index: 12, kind: input, shape index: {}]   ;;  %s5606_s13 = inlined_call_operand.vmem [shape: f32[1,2048], index: 13, kind: input, shape index: {}]   ;;  %s5607_s14 = inlined_call_operand.vmem [shape: bf16[2048,32], index: 14, kind: input, shape index: {}]   ;;  %s5608_s15 = inlined_call_operand.vmem [shape: f32[1,32], index: 15, kind: input, shape index: {}]   ;;  %s5609_s16 = inlined_call_operand.vmem [shape: f32[1,32], index: 16, kind: input, shape index: {}]   ;;  %s5610_s17 = inlined_call_operand.vmem [shape: f32[1,32], index: 17, kind: input, shape index: {}]   ;;  %s5611_s18 = inlined_call_operand.hbm [shape: f32[16,32], index: 18, kind: output, shape index: {}]  }
   0x1   :  { %5615 = sst [smem:[#allocation5_spill]] %s5593_s0 }
   0x2   :  { %5616 = sst [smem:[#allocation6_spill]] %s5594_s1 }
   0x3   :  { %5617 = sst [smem:[#allocation7_spill]] %s5595_s2 }
   0x4   :  { %v156_v0 = vld [vmem:[%s5597_s4] sm:$0xff]  ;;  %v157_v1 = vld [vmem:[%s5597_s4 + $0x8] sm:$0xff]  ;;  %v158_v2 = vld [vmem:[%s5597_s4 + $0x10] sm:$0xff]  ;;  %vm74_vm0 = vcmask 261120   ;;  %s5618_s2 = sld [smem:[#allocation5_spill]]  ;;  %s5619_s25 = sld [smem:[#allocation7_spill]] }
   0x5   :  { %v3996_v3 = vpack.c.bf16 %v157_v1, %v156_v0  ;;  %v159_v4 = vld [vmem:[%s5597_s4 + $0x18] sm:$0xff] }
   0x6   :  { %v4000_v6 = vpack.c.bf16 %v159_v4, %v158_v2 }
   0x7   :  { %3997 = vmatprep.subr.bf16.mxu1 %v3996_v3 }
   0x8   :  { %3999 = vmatpush3.bf16.msra.mxu1 %v3996_v3 }
   0x9   :  { %4001 = vmatprep.subr.bf16.mxu1 %v4000_v6 }
   0xa   :  { %v61_v5 = vld [vmem:[%s5618_s2] sm:$0xff]  ;;  %v64_v8 = vld [vmem:[%s5619_s25 + $0x8] sm:$0xff]  ;;  %v65_v9 = vld [vmem:[%s5619_s25 + $0x10] sm:$0xff] }
   0xb   :  { %3827 = vmatprep.mubr.msk.f32.mxu1 %vm74_vm0, %v61_v5  ;;  %v63_v7 = vld [vmem:[%s5619_s25] sm:$0xff]  ;;  %3816 = vmatprep.mubr.msk.f32.mxu0 %vm74_vm0, %v61_v5  ;;  %v66_v11 = vld [vmem:[%s5619_s25 + $0x18] sm:$0xff]  ;;  %v62_v13 = vld [vmem:[%s5618_s2 + $0x8] sm:$0xff] }
   0xc   :  { %v3988_v10 = vpack.c.bf16 %v64_v8, %v63_v7  ;;  %v3992_v12 = vpack.c.bf16 %v66_v11, %v65_v9  ;;  %4003 = vmatpush3.bf16.msra.mxu1 %v4000_v6 }
   0xe   :  { %3989 = vmatprep.subr.bf16.mxu0 %v3988_v10 }
   0xf   :  { %3991 = vmatpush3.bf16.msra.mxu0 %v3988_v10  ;;  %3828 = vmatmul.mubr.msk.f32.vlgmr.msra.gmra.mrb[0].mxu1 %vm74_vm0, %v62_v13 }
  0x10   :  { %3993 = vmatprep.subr.bf16.mxu0 %v3992_v12 }
  0x13   :  { %3995 = vmatpush3.bf16.msra.mxu0 %v3992_v12 }
  0x16   :  { %3817 = vmatmul.mubr.msk.f32.vlgmr.msra.gmra.mrb[0].mxu0 %vm74_vm0, %v62_v13 }
  0x17   :  { %3838 = vmatprep.mubr.msk.f32.mxu0 %vm74_vm0, %v61_v5 }
  0x18   :  { %23 = vsyncpa [#allocation3], 0  ;;  %v242_v14 = vld [vmem:[%s5599_s6] sm:$0xff]  ;;  %v243_v15 = vld [vmem:[%s5599_s6 + $0x8] sm:$0xff]  ;;  %vm464_vm1 = vcmask 130048   ;;  %s4469_s30 = smov 96  }
  0x19   :  { %v4004_v16 = vpack.c.bf16 %v243_v15, %v242_v14  ;;  %v244_v17 = vld [vmem:[%s5599_s6 + $0x10] sm:$0xff]  ;;  %v245_v18 = vld [vmem:[%s5599_s6 + $0x18] sm:$0xff]  ;;  %v3281_v20 = vld [vmem:[%s5598_s5] ss:$0 sm:$0xff]  ;;  %s4466_s5 = smov 80   ;;  %s4467_s6 = smov 112  }
  0x1a   :  { %v4008_v19 = vpack.c.bf16 %v245_v18, %v244_v17  ;;  %v3278_v26 = vld [vmem:[%s5596_s3] ss:$0 sm:$0xff]  ;;  %vm4628_vm2 = vmpackc.low %vm464_vm1, %vm464_vm1  ;;  %s4468_s3 = smov 64   ;;  %s4470_s0 = smov 32   ;;  %vm1023_vm3 = vcmask 392192   ;;  %vm1026_vm4 = vcmask 523264  }
  0x1b   :  { %4005 = vmatprep.subr.bf16.mxu0 %v4004_v16  ;;  %s4471_s19 = smov 48   ;;  %s4472_s1 = smov 16   ;;  %v3284_v11 = vld [vmem:[%s5600_s7] ss:$0 sm:$0xff]  ;;  %vm1029_vm5 = vcmask 654336   ;;  %vm1032_vm6 = vcmask 785408  }
  0x1c   :  { %4007 = vmatpush3.bf16.msra.mxu0 %v4004_v16  ;;  %s5622_s23 = sld [smem:[#allocation6_spill]]  ;;  %vm1035_vm7 = vcmask 916480  }
  0x1d   :  { %4009 = vmatprep.subr.bf16.mxu0 %v4008_v19 }
  0x20   :  { %4011 = vmatpush3.bf16.msra.mxu0 %v4008_v19 }
  0x23   :  { %3839 = vmatmul.mubr.msk.f32.vlgmr.msra.gmra.mrb[2].mxu0 %vm74_vm0, %v62_v13 }
  0xe2   :  { %v3829_v21 = vpop.f32.mrb[0].mxu1 }
  0xe3   :  { %v239_v22 = vadd.f32 %v3829_v21, %v3281_v20  ;;  %v233_v23 = vpop.f32.mrb[1].mxu1 }
  0xe4   :  { %v234_v24 = vadd.f32 %v3281_v20, %v233_v23 }
  0xe6   :  { %v4145_v28 = vpack.i.bf16 %v239_v22, %v234_v24  ;;  %v4012_v29 = vpack.c.bf16 %v239_v22, %v234_v24 }
  0xe8   :  { %4146 = vrot.lane.b32.xlu1 %v4145_v28, %s4466_s5  ;;  %4136 = vrot.lane.b32.xlu0 %v4145_v28, %s4467_s6 }
  0xe9   :  { %v3818_v25 = vpop.f32.mrb[0].mxu0  ;;  %4014 = vmatprep.subr.msk.bf16.mxu1 %vm4628_vm2, %v4012_v29 }
  0xea   :  { %v147_v27 = vpop.f32.mrb[1].mxu0  ;;  %4017 = vmatpush3.bf16.xpose.msk.msra.mxu1 %vm4628_vm2, %v4012_v29  ;;  %v153_v32 = vadd.f32 %v3818_v25, %v3278_v26 }
  0xeb   :  { %v148_v31 = vadd.f32 %v3278_v26, %v147_v27 }
  0xec   :  { %4151 = vrot.lane.b32.xlu1 %v4145_v28, %s4468_s3  ;;  %4141 = vrot.lane.b32.xlu0 %v4145_v28, %s4469_s30 }
  0xed   :  { %3873 = vmatprep.mubr.msk.f32.mxu1 %vm464_vm1, %v148_v31 }
  0xf0   :  { %4161 = vrot.lane.b32.xlu1 %v4145_v28, %s4470_s0  ;;  %4156 = vrot.lane.b32.xlu0 %v4145_v28, %s4471_s19 }
  0xf4   :  { %4166 = vrot.lane.b32.xlu0 %v4145_v28, %s4472_s1  ;;  %330 = vrot.lane.b32.xlu1 %v148_v31, %s4467_s6 }
  0xf6   :  { %v3840_v12 = vpop.f32.mrb[2].mxu0 }
  0xf7   :  { %v325_v13 = vadd.f32 %v3840_v12, %v3284_v11  ;;  %v319_v14 = vpop.f32.mrb[3].mxu0 }
  0xf8   :  { %332 = vrot.lane.b32.xlu0 %v153_v32, %s4467_s6  ;;  %334 = vrot.lane.b32.xlu1 %v148_v31, %s4469_s30  ;;  %v320_v15 = vadd.f32 %v3284_v11, %v319_v14 }
  0xfa   :  { %v4704_v16 = vpack.i.bf16 %v325_v13, %v320_v15  ;;  %v4060_v17 = vpack.c.bf16 %v325_v13, %v320_v15  ;;  %v3531_v15 = vld [vmem:[%s5622_s23 + $0x38] sm:$0xff]  }
  0xfc   :  { %336 = vrot.lane.b32.xlu0 %v153_v32, %s4469_s30  ;;  %338 = vrot.lane.b32.xlu1 %v148_v31, %s4466_s5 }
  0xfd   :  { %4061 = vmatprep.subr.bf16.mxu0 %v4060_v17 }
  0xfe   :  { %4063 = vmatpush3.bf16.msra.mxu0 %v4060_v17 }
 0x100   :  { %340 = vrot.lane.b32.xlu0 %v153_v32, %s4466_s5  ;;  %342 = vrot.lane.b32.xlu1 %v148_v31, %s4468_s3 }
 0x104   :  { %344 = vrot.lane.b32.xlu0 %v153_v32, %s4468_s3  ;;  %346 = vrot.lane.b32.xlu1 %v148_v31, %s4471_s19 }
 0x108   :  { %348 = vrot.lane.b32.xlu0 %v153_v32, %s4471_s19  ;;  %350 = vrot.lane.b32.xlu1 %v148_v31, %s4470_s0 }
 0x10c   :  { %352 = vrot.lane.b32.xlu0 %v153_v32, %s4470_s0  ;;  %354 = vrot.lane.b32.xlu1 %v148_v31, %s4472_s1 }
 0x110   :  { %356 = vrot.lane.b32.xlu0 %v153_v32, %s4472_s1  ;;  %4176 = vrot.lane.b32.xlu1 %v4704_v16, %s4469_s30 }
 0x114   :  { %4171 = vrot.lane.b32.xlu0 %v4704_v16, %s4467_s6  ;;  %4186 = vrot.lane.b32.xlu1 %v4704_v16, %s4468_s3 }
 0x118   :  { %4181 = vrot.lane.b32.xlu0 %v4704_v16, %s4466_s5 }
 0x15a   :  { %v4137_v33 = vpop.permute.xlu0 %4136  ;;  %v4147_v40 = vpop.permute.xlu1 %4146 }
 0x15b   :  { %v4139_v34 = vunpack.i.h.bf16 %v4137_v33  ;;  %v4138_v35 = vunpack.i.l.bf16 %v4137_v33  ;;  %v4149_v42 = vunpack.i.h.bf16 %v4147_v40  ;;  %v4148_v43 = vunpack.i.l.bf16 %v4147_v40 }
 0x15d   :  { %v4018_v36 = vpack.c.bf16 %v4139_v34, %v4138_v35  ;;  %v4030_v44 = vpack.c.bf16 %v4149_v42, %v4148_v43  ;;  %v3494_v34 = vld [vmem:[%s5622_s23] sm:$0xff]  }
 0x15e   :  { %v4142_v37 = vpop.permute.xlu0 %4141  ;;  %v4152_v45 = vpop.permute.xlu1 %4151  ;;  %v3496_v35 = vunpack.c.h.bf16 %v3494_v34 }
 0x15f   :  { %v4144_v38 = vunpack.i.h.bf16 %v4142_v37  ;;  %v4143_v39 = vunpack.i.l.bf16 %v4142_v37  ;;  %4020 = vmatprep.subr.msk.bf16.mxu1 %vm4628_vm2, %v4018_v36  ;;  %v4154_v46 = vunpack.i.h.bf16 %v4152_v45  ;;  %v4153_v47 = vunpack.i.l.bf16 %v4152_v45  ;;  %v3525_v37 = vld [vmem:[%s5622_s23 + $0x8] sm:$0xff]  }
 0x160   :  { %4023 = vmatpush3.bf16.xpose.msk.msra.mxu1 %vm4628_vm2, %v4018_v36  ;;  %v3495_v36 = vunpack.c.l.bf16 %v3494_v34  ;;  %v3499_v43 = vunpack.c.l.bf16 %v3525_v37 }
 0x161   :  { %v4024_v41 = vpack.c.bf16 %v4144_v38, %v4143_v39  ;;  %v4036_v48 = vpack.c.bf16 %v4154_v46, %v4153_v47 }
 0x162   :  { %v4157_v49 = vpop.permute.xlu0 %4156  ;;  %v4162_v53 = vpop.permute.xlu1 %4161 }
 0x163   :  { %4026 = vmatprep.subr.msk.bf16.mxu1 %vm4628_vm2, %v4024_v41  ;;  %v4159_v50 = vunpack.i.h.bf16 %v4157_v49  ;;  %v4158_v51 = vunpack.i.l.bf16 %v4157_v49  ;;  %v4164_v54 = vunpack.i.h.bf16 %v4162_v53  ;;  %v4163_v55 = vunpack.i.l.bf16 %v4162_v53 }
 0x165   :  { %v4042_v52 = vpack.c.bf16 %v4159_v50, %v4158_v51  ;;  %v4048_v56 = vpack.c.bf16 %v4164_v54, %v4163_v55  ;;  %v3527_v51 = vld [vmem:[%s5622_s23 + $0x18] sm:$0xff]  }
 0x166   :  { %v4167_v57 = vpop.permute.xlu0 %4166  ;;  %v331_v61 = vpop.permute.xlu1 %330  ;;  %v3508_v55 = vunpack.c.h.bf16 %v3527_v51 }
 0x167   :  { %v4169_v58 = vunpack.i.h.bf16 %v4167_v57  ;;  %v4168_v59 = vunpack.i.l.bf16 %v4167_v57  ;;  %v3507_v57 = vunpack.c.l.bf16 %v3527_v51 }
 0x168   :  { %4029 = vmatpush3.bf16.xpose.msk.msra.mxu1 %vm4628_vm2, %v4024_v41  ;;  %v3500_v41 = vunpack.c.h.bf16 %v3525_v37 }
 0x169   :  { %4032 = vmatprep.subr.msk.bf16.mxu1 %vm4628_vm2, %v4030_v44  ;;  %v4054_v60 = vpack.c.bf16 %v4169_v58, %v4168_v59  ;;  %v3528_v58 = vld [vmem:[%s5622_s23 + $0x20] sm:$0xff]  }
 0x16a   :  { %v333_v62 = vpop.permute.xlu0 %332  ;;  %v335_v63 = vpop.permute.xlu1 %334 }
 0x16e   :  { %v337_v0 = vpop.permute.xlu0 %336  ;;  %v339_v1 = vpop.permute.xlu1 %338 }
 0x170   :  { %4035 = vmatpush3.bf16.xpose.msk.msra.mxu1 %vm4628_vm2, %v4030_v44  ;;  %v3526_v44 = vld [vmem:[%s5622_s23 + $0x10] sm:$0xff]  }
 0x171   :  { %4038 = vmatprep.subr.msk.bf16.mxu1 %vm4628_vm2, %v4036_v48  ;;  %v3503_v50 = vunpack.c.l.bf16 %v3526_v44 }
 0x172   :  { %v341_v2 = vpop.permute.xlu0 %340  ;;  %v343_v3 = vpop.permute.xlu1 %342 }
 0x176   :  { %v345_v4 = vpop.permute.xlu0 %344  ;;  %v347_v5 = vpop.permute.xlu1 %346 }
 0x178   :  { %4041 = vmatpush3.bf16.xpose.msk.msra.mxu1 %vm4628_vm2, %v4036_v48  ;;  %v3504_v48 = vunpack.c.h.bf16 %v3526_v44 }
 0x179   :  { %4044 = vmatprep.subr.msk.bf16.mxu1 %vm4628_vm2, %v4042_v52 }
 0x17a   :  { %v349_v6 = vpop.permute.xlu0 %348  ;;  %v351_v7 = vpop.permute.xlu1 %350 }
 0x17e   :  { %v353_v8 = vpop.permute.xlu0 %352  ;;  %v355_v9 = vpop.permute.xlu1 %354 }
 0x180   :  { %4047 = vmatpush3.bf16.xpose.msk.msra.mxu1 %vm4628_vm2, %v4042_v52 }
 0x181   :  { %4050 = vmatprep.subr.msk.bf16.mxu1 %vm4628_vm2, %v4048_v56 }
 0x182   :  { %v357_v10 = vpop.permute.xlu0 %356  ;;  %v4177_v19 = vpop.permute.xlu1 %4176 }
 0x183   :  { %v4179_v22 = vunpack.i.h.bf16 %v4177_v19  ;;  %v4178_v23 = vunpack.i.l.bf16 %v4177_v19 }
 0x185   :  { %v4068_v25 = vpack.c.bf16 %v4179_v22, %v4178_v23  ;;  %v3523_v22 = vunpack.c.l.bf16 %v3531_v15 }
 0x186   :  { %v4172_v18 = vpop.permute.xlu0 %4171  ;;  %v4187_v27 = vpop.permute.xlu1 %4186 }
 0x187   :  { %v4174_v20 = vunpack.i.h.bf16 %v4172_v18  ;;  %v4173_v21 = vunpack.i.l.bf16 %v4172_v18  ;;  %v4189_v31 = vunpack.i.h.bf16 %v4187_v27 }
 0x188   :  { %4053 = vmatpush3.bf16.xpose.msk.msra.mxu1 %vm4628_vm2, %v4048_v56 }
 0x189   :  { %4056 = vmatprep.subr.msk.bf16.mxu1 %vm4628_vm2, %v4054_v60  ;;  %v4064_v24 = vpack.c.bf16 %v4174_v20, %v4173_v21  ;;  %v3524_v20 = vunpack.c.h.bf16 %v3531_v15 }
 0x18a   :  { %v4182_v26 = vpop.permute.xlu0 %4181 }
 0x18b   :  { %4065 = vmatprep.subr.bf16.mxu0 %v4064_v24  ;;  %v4184_v28 = vunpack.i.h.bf16 %v4182_v26  ;;  %v4183_v29 = vunpack.i.l.bf16 %v4182_v26 }
 0x18c   :  { %4067 = vmatpush3.bf16.msra.mxu0 %v4064_v24 }
 0x18d   :  { %v4072_v30 = vpack.c.bf16 %v4184_v28, %v4183_v29  ;;  %4069 = vmatprep.subr.bf16.mxu0 %v4068_v25 }
 0x190   :  { %4059 = vmatpush3.bf16.xpose.msk.msra.mxu1 %vm4628_vm2, %v4054_v60  ;;  %4071 = vmatpush3.bf16.msra.mxu0 %v4068_v25 }
 0x191   :  { %4073 = vmatprep.subr.bf16.mxu0 %v4072_v30 }
 0x194   :  { %4075 = vmatpush3.bf16.msra.mxu0 %v4072_v30 }
 0x197   :  { %3874 = vmatmul.mubr.msk.f32.vlgmr.msra.gmra.mrb[2].mxu1 %vm464_vm1, %v153_v32  ;;  %v4188_v32 = vunpack.i.l.bf16 %v4187_v27 }
 0x198   :  { %3876 = vmatprep.mubr.msk.f32.mxu1 %vm464_vm1, %v331_v61 }
 0x199   :  { %v4076_v33 = vpack.c.bf16 %v4189_v31, %v4188_v32 }
 0x19b   :  { %3877 = vmatmul.mubr.msk.f32.gmra.mrb[4].mxu1 %vm464_vm1, %v333_v62  ;;  %4077 = vmatprep.subr.bf16.mxu0 %v4076_v33  ;;  %v3512_v62 = vunpack.c.h.bf16 %v3528_v58 }
 0x19c   :  { %3879 = vmatprep.mubr.msk.f32.mxu1 %vm464_vm1, %v335_v63  ;;  %4079 = vmatpush3.bf16.msra.mxu0 %v4076_v33 }
 0x19f   :  { %3880 = vmatmul.mubr.msk.f32.gmra.mrb[6].mxu1 %vm464_vm1, %v337_v0  ;;  %v3511_v0 = vunpack.c.l.bf16 %v3528_v58 }
 0x1a0   :  { %3882 = vmatprep.mubr.msk.f32.mxu1 %vm464_vm1, %v339_v1  ;;  %v3529_v1 = vld [vmem:[%s5622_s23 + $0x28] sm:$0xff]  }
 0x1a3   :  { %3883 = vmatmul.mubr.msk.f32.gmra.mrb[8].mxu1 %vm464_vm1, %v341_v2 }
 0x1a4   :  { %3885 = vmatprep.mubr.msk.f32.mxu1 %vm464_vm1, %v343_v3 }
 0x1a7   :  { %3886 = vmatmul.mubr.msk.f32.gmra.mrb[10].mxu1 %vm464_vm1, %v345_v4 }
 0x1a8   :  { %3888 = vmatprep.mubr.msk.f32.mxu1 %vm464_vm1, %v347_v5  ;;  %v3516_v5 = vunpack.c.h.bf16 %v3529_v1 }
 0x1ab   :  { %3889 = vmatmul.mubr.msk.f32.gmra.mrb[12].mxu1 %vm464_vm1, %v349_v6 }
 0x1ac   :  { %3891 = vmatprep.mubr.msk.f32.mxu1 %vm464_vm1, %v351_v7  ;;  %v3515_v7 = vunpack.c.l.bf16 %v3529_v1 }
 0x1af   :  { %3892 = vmatmul.mubr.msk.f32.gmra.mrb[14].mxu1 %vm464_vm1, %v353_v8  ;;  %v3530_v8 = vld [vmem:[%s5622_s23 + $0x30] sm:$0xff]  }
 0x1b0   :  { %3894 = vmatprep.mubr.msk.f32.mxu1 %vm464_vm1, %v355_v9  ;;  %v3520_v12 = vunpack.c.h.bf16 %v3530_v8  ;;  %v3519_v14 = vunpack.c.l.bf16 %v3530_v8 }
 0x1b3   :  { %3895 = vmatmul.mubr.msk.f32.gmra.mrb[16].mxu1 %vm464_vm1, %v357_v10 }
 0x26a   :  { %v3875_v38 = vpop.f32.mrb[2].mxu1 }
 0x26b   :  { %v4720_v39 = vadd.f32 %v3875_v38, %v3496_v35  ;;  %v595_v40 = vpop.f32.mrb[3].mxu1 }
 0x26c   :  { %v4722_v42 = vadd.f32 %v3495_v36, %v595_v40 }
 0x26d   :  { %676 = vmax.xlane.f32.xlu0 %v4720_v39 }
 0x26e   :  { %v3878_v45 = vpop.f32.mrb[4].mxu1  ;;  %674 = vmax.xlane.f32.xlu1 %v4722_v42 }
 0x26f   :  { %v4729_v46 = vadd.f32 %v3878_v45, %v3500_v41  ;;  %v605_v47 = vpop.f32.mrb[5].mxu1 }
 0x270   :  { %v4731_v49 = vadd.f32 %v3499_v43, %v605_v47 }
 0x272   :  { %v3881_v52 = vpop.f32.mrb[6].mxu1  ;;  %678 = vmax.xlane.f32.xlu0 %v4731_v49  ;;  %680 = vmax.xlane.f32.xlu1 %v4729_v46 }
 0x273   :  { %v4738_v53 = vadd.f32 %v3881_v52, %v3504_v48  ;;  %v615_v54 = vpop.f32.mrb[7].mxu1 }
 0x274   :  { %v4740_v56 = vadd.f32 %v3503_v50, %v615_v54 }
 0x276   :  { %v3884_v59 = vpop.f32.mrb[8].mxu1  ;;  %682 = vmax.xlane.f32.xlu0 %v4740_v56  ;;  %684 = vmax.xlane.f32.xlu1 %v4738_v53 }
 0x277   :  { %v4747_v60 = vadd.f32 %v3884_v59, %v3508_v55  ;;  %v625_v61 = vpop.f32.mrb[9].mxu1 }
 0x278   :  { %v4749_v63 = vadd.f32 %v3507_v57, %v625_v61 }
 0x27a   :  { %v3887_v2 = vpop.f32.mrb[10].mxu1  ;;  %686 = vmax.xlane.f32.xlu0 %v4749_v63  ;;  %688 = vmax.xlane.f32.xlu1 %v4747_v60 }
 0x27b   :  { %v4756_v3 = vadd.f32 %v3887_v2, %v3512_v62  ;;  %v635_v4 = vpop.f32.mrb[11].mxu1 }
 0x27c   :  { %v4758_v6 = vadd.f32 %v3511_v0, %v635_v4 }
 0x27e   :  { %v3890_v9 = vpop.f32.mrb[12].mxu1  ;;  %690 = vmax.xlane.f32.xlu0 %v4758_v6  ;;  %692 = vmax.xlane.f32.xlu1 %v4756_v3 }
 0x27f   :  { %v4765_v10 = vadd.f32 %v3890_v9, %v3516_v5  ;;  %v645_v11 = vpop.f32.mrb[13].mxu1 }
 0x280   :  { %v4767_v13 = vadd.f32 %v3515_v7, %v645_v11 }
 0x282   :  { %v3893_v17 = vpop.f32.mrb[14].mxu1  ;;  %694 = vmax.xlane.f32.xlu0 %v4767_v13  ;;  %696 = vmax.xlane.f32.xlu1 %v4765_v10 }
 0x283   :  { %v4774_v18 = vadd.f32 %v3893_v17, %v3520_v12  ;;  %v655_v19 = vpop.f32.mrb[15].mxu1 }
 0x284   :  { %v4776_v21 = vadd.f32 %v3519_v14, %v655_v19 }
 0x286   :  { %v3896_v23 = vpop.f32.mrb[16].mxu1  ;;  %698 = vmax.xlane.f32.xlu0 %v4776_v21  ;;  %700 = vmax.xlane.f32.xlu1 %v4774_v18 }
 0x287   :  { %v4780_v24 = vadd.f32 %v3896_v23, %v3524_v20  ;;  %v665_v25 = vpop.f32.mrb[17].mxu1 }
 0x288   :  { %v4782_v26 = vadd.f32 %v3523_v22, %v665_v25 }
 0x28a   :  { %702 = vmax.xlane.f32.xlu0 %v4782_v26  ;;  %704 = vmax.xlane.f32.xlu1 %v4780_v24 }
 0x2a0   :  { %4191 = vrot.lane.b32.xlu0 %v4704_v16, %s4471_s19 }
 0x2fa   :  { %v677_v27 = vpop.xlane.xlu0 %676 }
 0x2fb   :  { %v707_v28 = vsub.f32 %v4720_v39, %v677_v27  ;;  %v675_v29 = vpop.xlane.xlu1 %674 }
 0x2fc   :  { %v706_v30 = vsub.f32 %v4722_v42, %v675_v29 }
 0x2fd   :  { %v724_v31 = vmul.f32 1.442695, %v707_v28 }
 0x2fe   :  { %v722_v32 = vmul.f32 1.442695, %v706_v30 }
 0x2ff   :  { %4368 = vpow2.f32 %v724_v31  ;;  %v679_v33 = vpop.xlane.xlu0 %678  ;;  %v681_v34 = vpop.xlane.xlu1 %680 }
 0x300   :  { %v708_v35 = vsub.f32 %v4731_v49, %v679_v33  ;;  %v709_v36 = vsub.f32 %v4729_v46, %v681_v34  ;;  %4370 = vpow2.f32 %v722_v32 }
 0x302   :  { %v726_v37 = vmul.f32 1.442695, %v708_v35  ;;  %v728_v38 = vmul.f32 1.442695, %v709_v36 }
 0x303   :  { %v683_v40 = vpop.xlane.xlu0 %682  ;;  %v685_v41 = vpop.xlane.xlu1 %684 }
 0x304   :  { %4372 = vpow2.f32 %v726_v37  ;;  %v711_v39 = vsub.f32 %v4738_v53, %v685_v41  ;;  %v710_v42 = vsub.f32 %v4740_v56, %v683_v40 }
 0x305   :  { %4374 = vpow2.f32 %v728_v38 }
 0x306   :  { %v732_v43 = vmul.f32 1.442695, %v711_v39  ;;  %v730_v46 = vmul.f32 1.442695, %v710_v42 }
 0x307   :  { %v687_v44 = vpop.xlane.xlu0 %686  ;;  %v689_v47 = vpop.xlane.xlu1 %688 }
 0x308   :  { %v712_v45 = vsub.f32 %v4749_v63, %v687_v44  ;;  %4376 = vpow2.f32 %v732_v43  ;;  %v713_v50 = vsub.f32 %v4747_v60, %v689_v47 }
 0x309   :  { %v4795_v48 = vpop.eup %4368 }
 0x30a   :  { %v734_v49 = vmul.f32 1.442695, %v712_v45  ;;  %756 = vadd.xlane.f32.xlu1 %v4795_v48  ;;  %v4799_v52 = vpop.eup %4370  ;;  %v736_v54 = vmul.f32 1.442695, %v713_v50 }
 0x30b   :  { %v691_v51 = vpop.xlane.xlu0 %690  ;;  %v693_v4 = vpop.xlane.xlu1 %692 }
 0x30c   :  { %4378 = vpow2.f32 %v734_v49  ;;  %v715_v12 = vsub.f32 %v4756_v3, %v693_v4  ;;  %v714_v19 = vsub.f32 %v4758_v6, %v691_v51 }
 0x30d   :  { %4380 = vpow2.f32 %v730_v46 }
 0x30e   :  { %v4801_v53 = vpop.eup %4372  ;;  %754 = vadd.xlane.f32.xlu1 %v4799_v52  ;;  %4382 = vpow2.f32 %v736_v54  ;;  %v740_v20 = vmul.f32 1.442695, %v715_v12  ;;  %v738_v23 = vmul.f32 1.442695, %v714_v19 }
 0x30f   :  { %758 = vadd.xlane.f32.xlu0 %v4801_v53  ;;  %v695_v55 = vpop.xlane.xlu0 %694  ;;  %v4805_v56 = vpop.eup %4374 }
 0x310   :  { %v697_v5 = vpop.xlane.xlu1 %696 }
 0x311   :  { %v717_v7 = vsub.f32 %v4765_v10, %v697_v5  ;;  %v716_v10 = vsub.f32 %v4767_v13, %v695_v55 }
 0x312   :  { %760 = vadd.xlane.f32.xlu1 %v4805_v56  ;;  %v4808_v58 = vpop.eup %4376 }
 0x313   :  { %v699_v57 = vpop.xlane.xlu0 %698  ;;  %v744_v9 = vmul.f32 1.442695, %v717_v7  ;;  %v742_v3 = vmul.f32 1.442695, %v716_v10 }
 0x314   :  { %v701_v8 = vpop.xlane.xlu1 %700 }
 0x315   :  { %v719_v11 = vsub.f32 %v4774_v18, %v701_v8  ;;  %4384 = vpow2.f32 %v744_v9 }
 0x316   :  { %v4810_v59 = vpop.eup %4378  ;;  %764 = vadd.xlane.f32.xlu1 %v4808_v58 }
 0x317   :  { %766 = vadd.xlane.f32.xlu0 %v4810_v59  ;;  %v703_v60 = vpop.xlane.xlu0 %702  ;;  %v4814_v61 = vpop.eup %4380  ;;  %v748_v14 = vmul.f32 1.442695, %v719_v11 }
 0x318   :  { %v4817_v1 = vpop.eup %4382  ;;  %v720_v15 = vsub.f32 %v4782_v26, %v703_v60  ;;  %v705_v17 = vpop.xlane.xlu1 %704  ;;  %v718_v26 = vsub.f32 %v4776_v21, %v699_v57 }
 0x319   :  { %4386 = vpow2.f32 %v748_v14 }
 0x31a   :  { %762 = vadd.xlane.f32.xlu1 %v4814_v61  ;;  %v750_v22 = vmul.f32 1.442695, %v720_v15  ;;  %4388 = vpow2.f32 %v740_v20  ;;  %v746_v27 = vmul.f32 1.442695, %v718_v26 }
 0x31b   :  { %v4192_v62 = vpop.permute.xlu0 %4191 }
 0x31c   :  { %v4194_v63 = vunpack.i.h.bf16 %v4192_v62  ;;  %v4193_v0 = vunpack.i.l.bf16 %v4192_v62  ;;  %4390 = vpow2.f32 %v750_v22 }
 0x31d   :  { %4392 = vpow2.f32 %v738_v23 }
 0x31e   :  { %v4080_v2 = vpack.c.bf16 %v4194_v63, %v4193_v0  ;;  %768 = vadd.xlane.f32.xlu1 %v4817_v1 }
 0x31f   :  { %v4831_v25 = vpop.eup %4384 }
 0x320   :  { %4081 = vmatprep.subr.bf16.mxu0 %v4080_v2 }
 0x321   :  { %4083 = vmatpush3.bf16.msra.mxu0 %v4080_v2 }
 0x323   :  { %v4835_v6 = vpop.eup %4386 }
 0x32d   :  { %4196 = vrot.lane.b32.xlu0 %v4704_v16, %s4470_s0 }
 0x32f   :  { %4201 = vrot.lane.b32.xlu1 %v4704_v16, %s4472_s1  ;;  %v721_v16 = vsub.f32 %v4780_v24, %v705_v17  ;;  %v4838_v24 = vpop.eup %4388 }
 0x330   :  { %v4840_v13 = vpop.eup %4390 }
 0x331   :  { %v752_v18 = vmul.f32 1.442695, %v721_v16  ;;  %v4844_v28 = vpop.eup %4392 }
 0x333   :  { %4394 = vpow2.f32 %v752_v18 }
 0x334   :  { %4396 = vpow2.f32 %v742_v3 }
 0x335   :  { %4398 = vpow2.f32 %v746_v27 }
 0x33d   :  { %v4846_v21 = vpop.eup %4394 }
 0x33e   :  { %v4850_v29 = vpop.eup %4396 }
 0x33f   :  { %v4853_v30 = vpop.eup %4398 }
 0x34c   :  { %776 = vadd.xlane.f32.xlu0 %v4831_v25 }
 0x350   :  { %780 = vadd.xlane.f32.xlu0 %v4835_v6 }
 0x353   :  { %772 = vadd.xlane.f32.xlu1 %v4838_v24 }
 0x354   :  { %782 = vadd.xlane.f32.xlu0 %v4840_v13 }
 0x357   :  { %770 = vadd.xlane.f32.xlu1 %v4844_v28 }
 0x358   :  { %784 = vadd.xlane.f32.xlu0 %v4846_v21 }
 0x35b   :  { %774 = vadd.xlane.f32.xlu1 %v4850_v29 }
 0x35f   :  { %778 = vadd.xlane.f32.xlu1 %v4853_v30 }
 0x397   :  { %v757_v31 = vpop.xlane.xlu1 %756 }
 0x39b   :  { %v755_v32 = vpop.xlane.xlu1 %754 }
 0x39c   :  { %4400 = vrcp.f32 %v755_v32  ;;  %v759_v34 = vpop.xlane.xlu0 %758  ;;  %v1041_v32 = vld [vmem:[%s5601_s8 + $0x18] sm:$0xff] }
 0x39d   :  { %4402 = vrcp.f32 %v757_v31 }
 0x39e   :  { %4404 = vrcp.f32 %v759_v34  ;;  %v1042_v34 = vld [vmem:[%s5601_s8 + $0x20] sm:$0xff] }
 0x39f   :  { %v761_v33 = vpop.xlane.xlu1 %760 }
 0x3a0   :  { %4406 = vrcp.f32 %v761_v33 }
 0x3a3   :  { %v765_v35 = vpop.xlane.xlu1 %764 }
 0x3a4   :  { %v767_v36 = vpop.xlane.xlu0 %766 }
 0x3a6   :  { %v4401_v37 = vpop.eup %4400 }
 0x3a7   :  { %v763_v38 = vpop.xlane.xlu1 %762  ;;  %v802_v40 = vmul.f32 %v4401_v37, %v4799_v52  ;;  %v4403_v50 = vpop.eup %4402 }
 0x3a8   :  { %v4197_v41 = vpop.permute.xlu0 %4196  ;;  %4408 = vrcp.f32 %v763_v38  ;;  %v4405_v51 = vpop.eup %4404  ;;  %v803_v52 = vmul.f32 %v4403_v50, %v4795_v48  ;;  %v1048_v50 = vld [vmem:[%s5601_s8 + $0x50] sm:$0xff] }
 0x3a9   :  { %v4199_v39 = vunpack.i.h.bf16 %v4197_v41  ;;  %v4198_v42 = vunpack.i.l.bf16 %v4197_v41  ;;  %3929 = vmatprep.mubr.f32.mxu0 %v802_v40  ;;  %4410 = vrcp.f32 %v765_v35  ;;  %v804_v55 = vmul.f32 %v4405_v51, %v4801_v53  ;;  %v1043_v35 = vld [vmem:[%s5601_s8 + $0x28] sm:$0xff]  ;;  %v1044_v41 = vld [vmem:[%s5601_s8 + $0x30] sm:$0xff]  ;;  %v1049_v51 = vld [vmem:[%s5601_s8 + $0x58] sm:$0xff] }
 0x3aa   :  { %4412 = vrcp.f32 %v767_v36  ;;  %v4407_v54 = vpop.eup %4406  ;;  %v4100_v40 = vpack.c.bf16 %v1043_v35, %v1042_v34 }
 0x3ab   :  { %v4084_v43 = vpack.c.bf16 %v4199_v39, %v4198_v42  ;;  %v769_v44 = vpop.xlane.xlu1 %768  ;;  %v805_v60 = vmul.f32 %v4407_v54, %v4805_v56  ;;  %v1045_v39 = vld [vmem:[%s5601_s8 + $0x38] sm:$0xff]  ;;  %v1050_v54 = vld [vmem:[%s5601_s8 + $0x60] sm:$0xff] }
 0x3ac   :  { %4414 = vrcp.f32 %v769_v44 }
 0x3ad   :  { %4085 = vmatprep.subr.bf16.mxu0 %v4084_v43 }
 0x3ae   :  { %4087 = vmatpush3.bf16.msra.mxu0 %v4084_v43 }
 0x3af   :  { %v4202_v45 = vpop.permute.xlu1 %4201 }
 0x3b0   :  { %v4204_v47 = vunpack.i.h.bf16 %v4202_v45  ;;  %v4203_v49 = vunpack.i.l.bf16 %v4202_v45  ;;  %v4104_v45 = vpack.c.bf16 %v1045_v39, %v1044_v41  ;;  %v3319_v39 = vld [vmem:[%s5602_s9] ss:$0 sm:$0xff] }
 0x3b2   :  { %v4088_v46 = vpack.c.bf16 %v4204_v47, %v4203_v49  ;;  %v4409_v57 = vpop.eup %4408  ;;  %v1046_v47 = vld [vmem:[%s5601_s8 + $0x40] sm:$0xff]  ;;  %v1047_v49 = vld [vmem:[%s5601_s8 + $0x48] sm:$0xff] }
 0x3b3   :  { %v4411_v62 = vpop.eup %4410  ;;  %v806_v63 = vmul.f32 %v4409_v57, %v4814_v61 }
 0x3b4   :  { %4089 = vmatprep.subr.bf16.mxu0 %v4088_v46  ;;  %v4413_v0 = vpop.eup %4412  ;;  %v807_v2 = vmul.f32 %v4411_v62, %v4808_v58 }
 0x3b5   :  { %4091 = vmatpush3.bf16.msra.mxu0 %v4088_v46  ;;  %v808_v5 = vmul.f32 %v4413_v0, %v4810_v59  ;;  %v4108_v46 = vpack.c.bf16 %v1047_v49, %v1046_v47  ;;  %v1053_v0 = vld [vmem:[%s5601_s8 + $0x78] sm:$0xff]  ;;  %v4440_v47 = vld [vmem:[%s5618_s2 + $0x8] sm:$0xff] }
 0x3b6   :  { %v4415_v4 = vpop.eup %4414 }
 0x3b7   :  { %v809_v48 = vmul.f32 %v4415_v4, %v4817_v1 }
 0x3b8   :  { %3930 = vmatmul.mubr.f32.vlgmr.msra.gmra.mrb[4].mxu0 %v803_v52  ;;  %v4112_v52 = vpack.c.bf16 %v1049_v51, %v1048_v50 }
 0x3b9   :  { %3932 = vmatprep.mubr.f32.mxu0 %v804_v55  ;;  %v1051_v55 = vld [vmem:[%s5601_s8 + $0x68] sm:$0xff] }
 0x3ba   :  { %v4116_v57 = vpack.c.bf16 %v1051_v55, %v1050_v54 }
 0x3bc   :  { %3933 = vmatmul.mubr.f32.gmra.mrb[6].mxu0 %v805_v60 }
 0x3bd   :  { %3935 = vmatprep.mubr.f32.mxu0 %v806_v63  ;;  %v1052_v63 = vld [vmem:[%s5601_s8 + $0x70] sm:$0xff] }
 0x3be   :  { %v4120_v4 = vpack.c.bf16 %v1053_v0, %v1052_v63 }
 0x3c0   :  { %3936 = vmatmul.mubr.f32.gmra.mrb[8].mxu0 %v807_v2 }
 0x3c1   :  { %3938 = vmatprep.mubr.f32.mxu0 %v808_v5 }
 0x3c4   :  { %3939 = vmatmul.mubr.f32.gmra.mrb[10].mxu0 %v809_v48 }
 0x3d9   :  { %v777_v53 = vpop.xlane.xlu0 %776 }
 0x3dd   :  { %v781_v8 = vpop.xlane.xlu0 %780 }
 0x3e0   :  { %v773_v7 = vpop.xlane.xlu1 %772 }
 0x3e1   :  { %4416 = vrcp.f32 %v773_v7  ;;  %v783_v61 = vpop.xlane.xlu0 %782 }
 0x3e4   :  { %v771_v56 = vpop.xlane.xlu1 %770 }
 0x3e5   :  { %4418 = vrcp.f32 %v771_v56  ;;  %v785_v11 = vpop.xlane.xlu0 %784 }
 0x3e6   :  { %4420 = vrcp.f32 %v777_v53 }
 0x3e8   :  { %v775_v9 = vpop.xlane.xlu1 %774 }
 0x3e9   :  { %4422 = vrcp.f32 %v775_v9 }
 0x3ea   :  { %4424 = vrcp.f32 %v781_v8 }
 0x3eb   :  { %4426 = vrcp.f32 %v783_v61  ;;  %v4417_v59 = vpop.eup %4416 }
 0x3ec   :  { %v779_v58 = vpop.xlane.xlu1 %778  ;;  %v811_v14 = vmul.f32 %v4417_v59, %v4838_v24 }
 0x3ed   :  { %4428 = vrcp.f32 %v779_v58 }
 0x3ee   :  { %4430 = vrcp.f32 %v785_v11 }
 0x3ef   :  { %v4419_v12 = vpop.eup %4418 }
 0x3f0   :  { %v810_v1 = vmul.f32 %v4419_v12, %v4844_v28  ;;  %v4421_v15 = vpop.eup %4420 }
 0x3f1   :  { %v813_v22 = vmul.f32 %v4421_v15, %v4831_v25 }
 0x3f2   :  { %3941 = vmatprep.mubr.f32.mxu0 %v810_v1 }
 0x3f3   :  { %v4423_v17 = vpop.eup %4422  ;;  %3942 = vmatmul.mubr.f32.gmra.mrb[12].mxu0 %v811_v14 }
 0x3f4   :  { %v812_v19 = vmul.f32 %v4423_v17, %v4850_v29  ;;  %v4425_v20 = vpop.eup %4424 }
 0x3f5   :  { %v4427_v16 = vpop.eup %4426  ;;  %v815_v18 = vmul.f32 %v4425_v20, %v4835_v6  ;;  %v1039_v6 = vld [vmem:[%s5601_s8 + $0x8] sm:$0xff] }
 0x3f6   :  { %3944 = vmatprep.mubr.f32.mxu0 %v812_v19  ;;  %v816_v26 = vmul.f32 %v4427_v16, %v4840_v13  ;;  %v1040_v13 = vld [vmem:[%s5601_s8 + $0x10] sm:$0xff] }
 0x3f7   :  { %v4429_v23 = vpop.eup %4428  ;;  %3945 = vmatmul.mubr.f32.gmra.mrb[14].mxu0 %v813_v22  ;;  %v4096_v33 = vpack.c.bf16 %v1041_v32, %v1040_v13 }
 0x3f8   :  { %v814_v10 = vmul.f32 %v4429_v23, %v4853_v30  ;;  %v4431_v3 = vpop.eup %4430  ;;  %v1038_v30 = vld [vmem:[%s5601_s8] sm:$0xff] }
 0x3f9   :  { %v817_v27 = vmul.f32 %v4431_v3, %v4846_v21  ;;  %v4092_v31 = vpack.c.bf16 %v1039_v6, %v1038_v30 }
 0x3fa   :  { %3947 = vmatprep.mubr.f32.mxu0 %v814_v10 }
 0x3fb   :  { %3948 = vmatmul.mubr.f32.gmra.mrb[16].mxu0 %v815_v18  ;;  %4093 = vmatprep.subr.bf16.mxu0 %v4092_v31 }
 0x3fc   :  { %3950 = vmatprep.mubr.f32.mxu0 %v816_v26  ;;  %4095 = vmatpush3.bf16.msra.mxu0 %v4092_v31 }
 0x3fd   :  { %4097 = vmatprep.subr.bf16.mxu0 %v4096_v33 }
 0x3ff   :  { %3951 = vmatmul.mubr.f32.gmra.mrb[18].mxu0 %v817_v27 }
 0x400   :  { %4099 = vmatpush3.bf16.msra.mxu0 %v4096_v33 }
 0x401   :  { %4101 = vmatprep.subr.bf16.mxu0 %v4100_v40 }
 0x404   :  { %4103 = vmatpush3.bf16.msra.mxu0 %v4100_v40 }
 0x405   :  { %4105 = vmatprep.subr.bf16.mxu0 %v4104_v45 }
 0x408   :  { %4107 = vmatpush3.bf16.msra.mxu0 %v4104_v45 }
 0x409   :  { %4109 = vmatprep.subr.bf16.mxu0 %v4108_v46 }
 0x40c   :  { %4111 = vmatpush3.bf16.msra.mxu0 %v4108_v46  ;;  %v4441_v46 = vld [vmem:[%s5618_s2] sm:$0xff] }
 0x40d   :  { %4113 = vmatprep.subr.bf16.mxu0 %v4112_v52 }
 0x410   :  { %4115 = vmatpush3.bf16.msra.mxu0 %v4112_v52 }
 0x411   :  { %4117 = vmatprep.subr.bf16.mxu0 %v4116_v57 }
 0x414   :  { %4119 = vmatpush3.bf16.msra.mxu0 %v4116_v57 }
 0x415   :  { %4121 = vmatprep.subr.bf16.mxu0 %v4120_v4 }
 0x418   :  { %4123 = vmatpush3.bf16.msra.mxu0 %v4120_v4 }
 0x48b   :  { %v4872_v24 = vpop.f32.mrb[4].mxu0 }
 0x48c   :  { %v4874_v25 = vpop.f32.mrb[5].mxu0 }
 0x48f   :  { %v3934_v28 = vpop.f32.mrb[6].mxu0 }
 0x490   :  { %v894_v29 = vpop.f32.mrb[7].mxu0 }
 0x491   :  { %v4205_v21 = vpack.i.bf16 %v3934_v28, %v894_v29 }
 0x493   :  { %4206 = vrot.lane.b32.xlu0 %v4205_v21, %s4472_s1  ;;  %v3937_v36 = vpop.f32.mrb[8].mxu0 }
 0x494   :  { %v904_v37 = vpop.f32.mrb[9].mxu0 }
 0x495   :  { %v4210_v38 = vpack.i.bf16 %v3937_v36, %v904_v37 }
 0x497   :  { %4211 = vrot.lane.b32.xlu1 %v4210_v38, %s4470_s0  ;;  %v3940_v42 = vpop.f32.mrb[10].mxu0  ;;  %s4474_s0 = smov [#allocation2]  }
 0x498   :  { %v914_v43 = vpop.f32.mrb[11].mxu0  ;;  %s3267_s7 = sshll.u32 %s4474_s0, 4  ;;  %s3268_s7 = int_to_ptr.vmem [resolvable:$true] %s3267_s7 }
 0x499   :  { %v4215_v44 = vpack.i.bf16 %v3940_v42, %v914_v43  ;;  %s4442_s22 = scalar_lea.vmem %s3268_s7, 256  ;;  %p4447_p1 = scmp.lt.s32.totalorder %s3268_s7, %s3268_s7 }
 0x49a   :  { %p4443_p0 = scmp.ne.s32.totalorder %s3268_s7, %s4442_s22  ;;  %p4448_p2 = scmp.lt.s32.totalorder %s4442_s22, %s4442_s22 }
 0x49b   :  { %4216 = vrot.lane.b32.xlu0 %v4215_v44, %s4471_s19 }
 0x49c   :  { %p4449_p3 = por %p4448_p2, %p4447_p1 }
 0x49e   :  { %p4450_p4 = pnand %p4449_p3, %p4443_p0 }
 0x4c6   :  { %v3943_v60 = vpop.f32.mrb[12].mxu0 }
 0x4c7   :  { %v924_v62 = vpop.f32.mrb[13].mxu0 }
 0x4c8   :  { %v4220_v2 = vpack.i.bf16 %v3943_v60, %v924_v62 }
 0x4ca   :  { %4221 = vrot.lane.b32.xlu0 %v4220_v2, %s4468_s3  ;;  %v3946_v5 = vpop.f32.mrb[14].mxu0 }
 0x4cb   :  { %v934_v48 = vpop.f32.mrb[15].mxu0 }
 0x4cc   :  { %v4225_v53 = vpack.i.bf16 %v3946_v5, %v934_v48  ;;  %v1184_v48 = vld [vmem:[%s5605_s12] sm:$0xff] }
 0x4ce   :  { %4226 = vrot.lane.b32.xlu0 %v4225_v53, %s4466_s5  ;;  %v3949_v7 = vpop.f32.mrb[16].mxu0  ;;  %v1192_v53 = vld [vmem:[%s5605_s12 + $0x40] sm:$0xff] }
 0x4cf   :  { %v944_v8 = vpop.f32.mrb[17].mxu0 }
 0x4d0   :  { %v4230_v56 = vpack.i.bf16 %v3949_v7, %v944_v8  ;;  %v1187_v7 = vld [vmem:[%s5605_s12 + $0x18] sm:$0xff]  ;;  %v3323_v8 = vcombine.high %v1184_v48, %v1192_v53 }
 0x4d2   :  { %4231 = vrot.lane.b32.xlu1 %v4230_v56, %s4469_s30  ;;  %v3952_v61 = vpop.f32.mrb[18].mxu0  ;;  %v1195_v56 = vld [vmem:[%s5605_s12 + $0x58] sm:$0xff]  ;;  %1463 = vmatprep.subr.bf16.mxu0 %v3323_v8 }
 0x4d3   :  { %v954_v9 = vpop.f32.mrb[19].mxu0 }
 0x4d4   :  { %v4235_v58 = vpack.i.bf16 %v3952_v61, %v954_v9  ;;  %v3322_v61 = vcombine.low %v1184_v48, %v1192_v53  ;;  %v3328_v9 = vcombine.low %v1187_v7, %v1195_v56  ;;  %v1188_v48 = vld [vmem:[%s5605_s12 + $0x20] sm:$0xff] }
 0x4d5   :  { %v1196_v53 = vld [vmem:[%s5605_s12 + $0x60] sm:$0xff] }
 0x4d6   :  { %4236 = vrot.lane.b32.xlu0 %v4235_v58, %s4467_s6  ;;  %v3329_v58 = vcombine.high %v1187_v7, %v1195_v56  ;;  %v3331_v56 = vcombine.high %v1188_v48, %v1196_v53 }
 0x4d8   :  { %1592 = vmatprep.subr.bf16.mxu1 %v3329_v58  ;;  %v1212_v58 = vld [vmem:[%s5605_s12 + $0xe0] sm:$0xff] }
 0x4d9   :  { %1593 = vmatpush1.bf16.msra.mxu1 %v3328_v9  ;;  %v1204_v9 = vld [vmem:[%s5605_s12 + $0xa0] sm:$0xff] }
 0x505   :  { %v4207_v11 = vpop.permute.xlu0 %4206 }
 0x506   :  { %v4209_v14 = vunpack.i.h.bf16 %v4207_v11  ;;  %v4208_v15 = vunpack.i.l.bf16 %v4207_v11  ;;  %v1200_v11 = vld [vmem:[%s5605_s12 + $0x80] sm:$0xff] }
 0x508   :  { %v1020_v3 = vsel %vm464_vm1, %v4872_v24, %v4209_v14  ;;  %v1019_v26 = vsel %vm464_vm1, %v4874_v25, %v4208_v15  ;;  %v1211_v14 = vld [vmem:[%s5605_s12 + $0xd8] sm:$0xff] }
 0x509   :  { %v4212_v1 = vpop.permute.xlu1 %4211 }
 0x50a   :  { %v4214_v17 = vunpack.i.h.bf16 %v4212_v1  ;;  %v4213_v19 = vunpack.i.l.bf16 %v4212_v1 }
 0x50c   :  { %v1022_v29 = vsel %vm74_vm0, %v1020_v3, %v4214_v17  ;;  %v1021_v30 = vsel %vm74_vm0, %v1019_v26, %v4213_v19  ;;  %v1197_v3 = vld [vmem:[%s5605_s12 + $0x68] sm:$0xff] }
 0x50d   :  { %v4217_v59 = vpop.permute.xlu0 %4216 }
 0x50e   :  { %v4219_v22 = vunpack.i.h.bf16 %v4217_v59  ;;  %v4218_v16 = vunpack.i.l.bf16 %v4217_v59  ;;  %v1208_v59 = vld [vmem:[%s5605_s12 + $0xc0] sm:$0xff] }
 0x50f   :  { %v3339_v1 = vcombine.high %v1200_v11, %v1208_v59  ;;  %v3338_v15 = vcombine.low %v1200_v11, %v1208_v59  ;;  %v3330_v11 = vcombine.low %v1188_v48, %v1196_v53  ;;  %v3347_v59 = vcombine.high %v1204_v9, %v1212_v58 }
 0x510   :  { %v1025_v21 = vsel %vm1023_vm3, %v1022_v29, %v4219_v22  ;;  %v1024_v31 = vsel %vm1023_vm3, %v1021_v30, %v4218_v16  ;;  %v1193_v22 = vld [vmem:[%s5605_s12 + $0x48] sm:$0xff] }
 0x511   :  { %v1189_v16 = vld [vmem:[%s5605_s12 + $0x28] sm:$0xff] }
 0x512   :  { %v3332_v26 = vcombine.low %v1189_v16, %v1197_v3 }
 0x53c   :  { %v4222_v12 = vpop.permute.xlu0 %4221 }
 0x53d   :  { %v4224_v23 = vunpack.i.h.bf16 %v4222_v12  ;;  %v4223_v10 = vunpack.i.l.bf16 %v4222_v12  ;;  %v1203_v12 = vld [vmem:[%s5605_s12 + $0x98] sm:$0xff] }
 0x53e   :  { %v3344_v17 = vcombine.low %v1203_v12, %v1211_v14  ;;  %v3345_v19 = vcombine.high %v1203_v12, %v1211_v14  ;;  %v4247_v12 = vld [vmem:[%s5607_s14 + $0x80] sm:$0xff]   ;;  %v1198_v14 = vld [vmem:[%s5605_s12 + $0x70] sm:$0xff] }
 0x53f   :  { %v1028_v32 = vsel %vm1026_vm4, %v1025_v21, %v4224_v23  ;;  %v1027_v24 = vsel %vm1026_vm4, %v1024_v31, %v4223_v10  ;;  %v4473_v23 = vmov 0  }
 0x540   :  { %v4227_v20 = vpop.permute.xlu0 %4226  ;;  %1594 = vmatprep.subr.bf16.mxu1 %v3345_v19  ;;  %1624 = vmatprep.mubr.bf16.mxu1 %v4473_v23 }
 0x541   :  { %v4229_v27 = vunpack.i.h.bf16 %v4227_v20  ;;  %v4228_v28 = vunpack.i.l.bf16 %v4227_v20  ;;  %v1185_v20 = vld [vmem:[%s5605_s12 + $0x8] sm:$0xff]  ;;  %1595 = vmatpush1.bf16.msra.mxu1 %v3344_v17  ;;  %v3346_v17 = vcombine.low %v1204_v9, %v1212_v58 }
 0x542   :  { %v3324_v10 = vcombine.low %v1185_v20, %v1193_v22 }
 0x543   :  { %v1031_v25 = vsel %vm1029_vm5, %v1028_v32, %v4229_v27  ;;  %v1030_v36 = vsel %vm1029_vm5, %v1027_v24, %v4228_v28  ;;  %v3333_v27 = vcombine.high %v1189_v16, %v1197_v3  ;;  %v3320_v32 = vld [vmem:[%s5603_s10] ss:$0 sm:$0xff]  ;;  %v1214_v16 = vld [vmem:[%s5605_s12 + $0xf0] sm:$0xff] }
 0x544   :  { %v4232_v18 = vpop.permute.xlu1 %4231 }
 0x545   :  { %v4234_v6 = vunpack.i.h.bf16 %v4232_v18  ;;  %v4233_v13 = vunpack.i.l.bf16 %v4232_v18  ;;  %v3325_v18 = vcombine.high %v1185_v20, %v1193_v22  ;;  %1678 = vmatprep.subr.bf16.mxu1 %v3333_v27  ;;  %v4251_v20 = vld [vmem:[%s5607_s14 + $0x88] sm:$0xff]   ;;  %v1206_v22 = vld [vmem:[%s5605_s12 + $0xb0] sm:$0xff]  ;;  %v4257_v27 = vld [vmem:[%s5607_s14 + $0xd8] sm:$0xff]  }
 0x546   :  { %v3351_v3 = vcombine.high %v1206_v22, %v1214_v16 }
 0x547   :  { %v1034_v37 = vsel %vm1032_vm6, %v1031_v25, %v4234_v6  ;;  %v1033_v38 = vsel %vm1032_vm6, %v1030_v36, %v4233_v13  ;;  %v3321_v25 = vld [vmem:[%s5604_s11] ss:$0 sm:$0xff] }
 0x548   :  { %v4237_v33 = vpop.permute.xlu0 %4236 }
 0x549   :  { %v4239_v34 = vunpack.i.h.bf16 %v4237_v33  ;;  %v4238_v35 = vunpack.i.l.bf16 %v4237_v33 }
 0x54b   :  { %v1036_v40 = vsel %vm1035_vm7, %v1033_v38, %v4238_v35  ;;  %v1037_v41 = vsel %vm1035_vm7, %v1034_v37, %v4239_v34  ;;  %v1201_v37 = vld [vmem:[%s5605_s12 + $0x88] sm:$0xff] }
 0x54c   :  { %3985 = vmatprep.mubr.f32.mxu0 %v1036_v40  ;;  %v1209_v40 = vld [vmem:[%s5605_s12 + $0xc8] sm:$0xff] }
 0x54d   :  { %3986 = vmatmul.mubr.f32.vlgmr.msra.gmra.mrb[20].mxu0 %v1037_v41  ;;  %v1205_v41 = vld [vmem:[%s5605_s12 + $0xa8] sm:$0xff] }
 0x54e   :  { %1464 = vmatpush1.bf16.msra.mxu0 %v3322_v61  ;;  %1495 = vmatprep.mubr.bf16.mxu0 %v4473_v23  ;;  %v4245_v61 = vld [vmem:[%s5607_s14 + $0xc0] sm:$0xff]  }
 0x54f   :  { %1465 = vmatprep.subr.bf16.mxu0 %v3339_v1  ;;  %v1190_v1 = vld [vmem:[%s5605_s12 + $0x30] sm:$0xff] }
 0x550   :  { %v3335_v19 = vcombine.high %v1190_v1, %v1198_v14 }
 0x552   :  { %1466 = vmatpush1.bf16.msra.mxu0 %v3338_v15  ;;  %v4249_v15 = vld [vmem:[%s5607_s14 + $0xc8] sm:$0xff]  }
 0x553   :  { %1506 = vmatprep.subr.bf16.mxu0 %v3325_v18  ;;  %v3334_v18 = vcombine.low %v1190_v1, %v1198_v14 }
 0x620   :  { %v3987_v42 = vpop.f32.mrb[20].mxu0 }
 0x621   :  { %v1133_v43 = vadd.f32 %v3987_v42, %v3319_v39  ;;  %v1127_v44 = vpop.f32.mrb[21].mxu0 }
 0x622   :  { %v1128_v45 = vadd.f32 %v3319_v39, %v1127_v44  ;;  %v1213_v39 = vld [vmem:[%s5605_s12 + $0xe8] sm:$0xff]  ;;  %v3341_v44 = vcombine.high %v1201_v37, %v1209_v40 }
 0x623   :  { %v1137_v49 = vadd.f32 %v4440_v47, %v1133_v43  ;;  %v1186_v47 = vld [vmem:[%s5605_s12 + $0x10] sm:$0xff] }
 0x624   :  { %v1136_v50 = vadd.f32 %v4441_v46, %v1128_v45  ;;  %v3349_v45 = vcombine.high %v1205_v41, %v1213_v39  ;;  %v1191_v46 = vld [vmem:[%s5605_s12 + $0x38] sm:$0xff] }
 0x625   :  { %v1143_v51 = vsel %vm74_vm0, %v1137_v49, 0.0 }
 0x626   :  { %1144 = vadd.xlane.f32.xlu0 %v1143_v51  ;;  %v1140_v52 = vsel %vm74_vm0, %v1136_v50, 0.0  ;;  %v3340_v51 = vcombine.low %v1201_v37, %v1209_v40  ;;  %v4261_v37 = vld [vmem:[%s5607_s14 + $0xe0] sm:$0xff]   ;;  %v4262_v40 = vld [vmem:[%s5607_s14 + $0x30] sm:$0xff]  }
 0x627   :  { %1141 = vadd.xlane.f32.xlu1 %v1140_v52  ;;  %v3348_v52 = vcombine.low %v1205_v41, %v1213_v39  ;;  %v4263_v41 = vld [vmem:[%s5607_s14 + $0xa0] sm:$0xff]   ;;  %v4264_v39 = vld [vmem:[%s5607_s14 + $0x78] sm:$0xff]  }
 0x6b3   :  { %v1145_v54 = vpop.xlane.xlu0 %1144 }
 0x6b4   :  { %v1148_v55 = vmul.f32 0.03125, %v1145_v54  ;;  %v1142_v57 = vpop.xlane.xlu1 %1141 }
 0x6b5   :  { %v1147_v60 = vmul.f32 0.03125, %v1142_v57  ;;  %v1202_v57 = vld [vmem:[%s5605_s12 + $0x90] sm:$0xff] }
 0x6b6   :  { %v1150_v62 = vsub.f32 %v1137_v49, %v1148_v55  ;;  %v1194_v49 = vld [vmem:[%s5605_s12 + $0x50] sm:$0xff] }
 0x6b7   :  { %v1149_v63 = vsub.f32 %v1136_v50, %v1147_v60  ;;  %v1199_v50 = vld [vmem:[%s5605_s12 + $0x78] sm:$0xff]  ;;  %v3327_v54 = vcombine.high %v1186_v47, %v1194_v49  ;;  %v1210_v60 = vld [vmem:[%s5605_s12 + $0xd0] sm:$0xff] }
 0x6b8   :  { %v1152_v0 = vmul.f32 %v1150_v62, %v1150_v62  ;;  %v3337_v55 = vcombine.high %v1191_v46, %v1199_v50  ;;  %v3342_v7 = vcombine.low %v1202_v57, %v1210_v60 }
 0x6b9   :  { %v1151_v2 = vmul.f32 %v1149_v63, %v1149_v63 }
 0x6ba   :  { %v1156_v4 = vsel %vm74_vm0, %v1152_v0, 0.0  ;;  %v3326_v0 = vcombine.low %v1186_v47, %v1194_v49  ;;  %v4267_v47 = vld [vmem:[%s5607_s14 + $0xa8] sm:$0xff]   ;;  %v4268_v49 = vld [vmem:[%s5607_s14 + $0xf0] sm:$0xff]  }
 0x6bb   :  { %1157 = vadd.xlane.f32.xlu1 %v1156_v4  ;;  %v1153_v5 = vsel %vm74_vm0, %v1151_v2, 0.0  ;;  %v3336_v2 = vcombine.low %v1191_v46, %v1199_v50  ;;  %v3343_v4 = vcombine.high %v1202_v57, %v1210_v60  ;;  %v4269_v46 = vld [vmem:[%s5607_s14 + $0x140] sm:$0xff]   ;;  %v5195_v57 = vld [vmem:[%s5606_s13 + $0x8] sm:$0xff] }
 0x6bc   :  { %1154 = vadd.xlane.f32.xlu0 %v1153_v5 }
 0x748   :  { %v1158_v28 = vpop.xlane.xlu1 %1157 }
 0x749   :  { %v1160_v29 = vmul.f32 0.03125, %v1158_v28  ;;  %v1155_v30 = vpop.xlane.xlu0 %1154  ;;  %v3350_v28 = vcombine.low %v1206_v22, %v1214_v16 }
 0x74a   :  { %v1159_v6 = vmul.f32 0.03125, %v1155_v30  ;;  %v4259_v30 = vld [vmem:[%s5607_s14 + $0x98] sm:$0xff]  }
 0x74b   :  { %v1162_v13 = vadd.f32 1e-05, %v1160_v29  ;;  %v4240_v29 = vld [vmem:[%s5607_s14 + $0x40] sm:$0xff]  }
 0x74c   :  { %v1161_v21 = vadd.f32 1e-05, %v1159_v6  ;;  %v4241_v6 = vld [vmem:[%s5607_s14] sm:$0xff]  }
 0x74d   :  { %4432 = vrsqrt.f32 %v1162_v13  ;;  %v4243_v13 = vld [vmem:[%s5607_s14 + $0x8] sm:$0xff]  }
 0x74e   :  { %4434 = vrsqrt.f32 %v1161_v21  ;;  %v4244_v21 = vld [vmem:[%s5607_s14 + $0x50] sm:$0xff]  }
 0x757   :  { %v4433_v31 = vpop.eup %4432 }
 0x758   :  { %v4435_v24 = vpop.eup %4434  ;;  %v1166_v33 = vmul.f32 %v4433_v31, %v1150_v62  ;;  %v1207_v62 = vld [vmem:[%s5605_s12 + $0xb8] sm:$0xff]  ;;  %v4246_v31 = vld [vmem:[%s5607_s14 + $0x10] sm:$0xff]  }
 0x759   :  { %v1165_v34 = vmul.f32 %v4435_v24, %v1149_v63  ;;  %v1215_v63 = vld [vmem:[%s5605_s12 + $0xf8] sm:$0xff] }
 0x75a   :  { %v1174_v35 = vmul.f32 %v3320_v32, %v1166_v33  ;;  %v3353_v5 = vcombine.high %v1207_v62, %v1215_v63  ;;  %v3352_v8 = vcombine.low %v1207_v62, %v1215_v63  ;;  %v4250_v24 = vld [vmem:[%s5607_s14 + $0x18] sm:$0xff]   ;;  %v4252_v33 = vld [vmem:[%s5607_s14 + $0x60] sm:$0xff]  }
 0x75b   :  { %v1173_v36 = vmul.f32 %v3320_v32, %v1165_v34  ;;  %v4248_v32 = vld [vmem:[%s5607_s14 + $0x58] sm:$0xff]   ;;  %v4256_v34 = vld [vmem:[%s5607_s14 + $0x68] sm:$0xff]   ;;  %v4277_v62 = vld [vmem:[%s5607_s14 + $0x1c0] sm:$0xff]  }
 0x75c   :  { %v5003_v38 = vadd.f32 %v3321_v25, %v1174_v35  ;;  %v4258_v35 = vld [vmem:[%s5607_s14 + $0x28] sm:$0xff]  }
 0x75d   :  { %v5014_v42 = vadd.f32 %v3321_v25, %v1173_v36  ;;  %v4254_v25 = vld [vmem:[%s5607_s14 + $0x20] sm:$0xff]   ;;  %v4260_v36 = vld [vmem:[%s5607_s14 + $0x70] sm:$0xff]  }
 0x75f   :  { %v5018_v43 = vpack.c.bf16 %v5003_v38, %v5014_v42 }
 0x761   :  { %3354 = vmatmul.mubr.msk.bf16.vlgmr.msra.gmra.mrb[24].mxu0 %vm74_vm0, %v5018_v43  ;;  %3357 = vmatmul.mubr.msk.bf16.vlgmr.msra.gmra.mrb[20].mxu1 %vm74_vm0, %v5018_v43 }
 0x762   :  { %1507 = vmatpush1.bf16.msra.mxu0 %v3324_v10  ;;  %1679 = vmatpush1.bf16.msra.mxu1 %v3332_v26  ;;  %v4253_v10 = vld [vmem:[%s5607_s14 + $0xd0] sm:$0xff]  }
 0x763   :  { %1508 = vmatprep.subr.bf16.mxu0 %v3341_v44  ;;  %1680 = vmatprep.subr.bf16.mxu1 %v3349_v45  ;;  %v4255_v26 = vld [vmem:[%s5607_s14 + $0x90] sm:$0xff]   ;;  %v1220_v44 = vlaneseq  ;;  %v4266_v45 = vld [vmem:[%s5607_s14 + $0x38] sm:$0xff]  }
 0x764   :  { %1538 = vmatprep.mubr.bf16.mxu0 %v4473_v23  ;;  %1710 = vmatprep.mubr.bf16.mxu1 %v4473_v23 }
 0x765   :  { %v5180_v50 = vshrl.u32 %v1220_v44, 7 }
 0x766   :  { %1509 = vmatpush1.bf16.msra.mxu0 %v3340_v51  ;;  %1681 = vmatpush1.bf16.msra.mxu1 %v3348_v52  ;;  %v4270_v51 = vld [vmem:[%s5607_s14 + $0xb0] sm:$0xff]   ;;  %v4272_v52 = vld [vmem:[%s5607_s14 + $0xf8] sm:$0xff]  }
 0x767   :  { %1549 = vmatprep.subr.bf16.mxu0 %v3327_v54  ;;  %1764 = vmatprep.subr.bf16.mxu1 %v3337_v55  ;;  %v1246_v54 = vsub.s32 6, %v5180_v50  ;;  %v4274_v55 = vld [vmem:[%s5607_s14 + $0xb8] sm:$0xff]   ;;  %v1222_v63 = vsub.s32 0, %v5180_v50  ;;  %v1234_v9 = vsub.s32 3, %v5180_v50 }
 0x769   :  { %3355 = vmatmul.mubr.msk.bf16.vlgmr.msra.gmra.mrb[28].mxu0 %vm74_vm0, %v5018_v43  ;;  %3359 = vmatmul.mubr.msk.bf16.vlgmr.msra.gmra.mrb[24].mxu1 %vm74_vm0, %v5018_v43  ;;  %v5198_v60 = vrot.slane %v5195_v57, %v1246_v54 }
 0x76a   :  { %1550 = vmatpush1.bf16.msra.mxu0 %v3326_v0  ;;  %1765 = vmatpush1.bf16.msra.mxu1 %v3336_v2  ;;  %v5207_v0 = vld [vmem:[%s5606_s13] sm:$0xff]  ;;  %v1226_v2 = vsub.s32 1, %v5180_v50 }
 0x76b   :  { %1551 = vmatprep.subr.bf16.mxu0 %v3343_v4  ;;  %1766 = vmatprep.subr.bf16.mxu1 %v3353_v5  ;;  %v1250_v4 = vsub.s32 7, %v5180_v50  ;;  %v1223_v5 = vrot.slane %v5207_v0, %v1222_v63  ;;  %v1247_v48 = vrot.slane %v5207_v0, %v1246_v54 }
 0x76c   :  { %1581 = vmatprep.mubr.bf16.mxu0 %v4473_v23  ;;  %1796 = vmatprep.mubr.bf16.mxu1 %v4473_v23  ;;  %v1227_v53 = vrot.slane %v5207_v0, %v1226_v2 }
 0x76e   :  { %1552 = vmatpush1.bf16.msra.mxu0 %v3342_v7  ;;  %1767 = vmatpush1.bf16.msra.mxu1 %v3352_v8  ;;  %v1251_v7 = vrot.slane %v5207_v0, %v1250_v4  ;;  %v1230_v8 = vsub.s32 2, %v5180_v50 }
 0x76f   :  { %1635 = vmatprep.subr.bf16.mxu0 %v3331_v56  ;;  %3654 = vmatprep.subr.bf16.mxu1 %v4245_v61 }
 0x771   :  { %3356 = vmatmul.mubr.msk.bf16.vlgmr.msra.gmra.mrb[32].mxu0 %vm74_vm0, %v5018_v43  ;;  %3361 = vmatmul.mubr.msk.bf16.vlgmr.msra.gmra.mrb[28].mxu1 %vm74_vm0, %v5018_v43 }
 0x772   :  { %1636 = vmatpush1.bf16.msra.mxu0 %v3330_v11  ;;  %1667 = vmatprep.mubr.bf16.mxu0 %v4473_v23 }
 0x773   :  { %1637 = vmatprep.subr.bf16.mxu0 %v3347_v59  ;;  %3655 = vmatpush3.bf16.msra.mxu1 %v4247_v12 }
 0x774   :  { %3656 = vmatprep.subr.bf16.mxu1 %v4249_v15 }
 0x776   :  { %1638 = vmatpush1.bf16.msra.mxu0 %v3346_v17 }
 0x777   :  { %1721 = vmatprep.subr.bf16.mxu0 %v3335_v19  ;;  %3657 = vmatpush3.bf16.msra.mxu1 %v4251_v20 }
 0x778   :  { %3658 = vmatprep.subr.bf16.mxu1 %v4253_v10  ;;  %v1231_v10 = vrot.slane %v5207_v0, %v1230_v8 }
 0x779   :  { %3358 = vmatmul.mubr.msk.bf16.vlgmr.msra.gmra.mrb[36].mxu0 %vm74_vm0, %v5018_v43 }
 0x77a   :  { %1722 = vmatpush1.bf16.msra.mxu0 %v3334_v18  ;;  %1753 = vmatprep.mubr.bf16.mxu0 %v4473_v23  ;;  %v4242_v23 = vld [vmem:[%s5607_s14 + $0x48] sm:$0xff]   ;;  %v1263_v18 = vrot.slane %v5195_v57, %v1230_v8 }
 0x77b   :  { %1723 = vmatprep.subr.bf16.mxu0 %v3351_v3  ;;  %3659 = vmatpush3.bf16.msra.mxu1 %v4255_v26  ;;  %v4275_v8 = vld [vmem:[%s5607_s14 + $0x108] sm:$0xff]  }
 0x77c   :  { %3660 = vmatprep.subr.bf16.mxu1 %v4257_v27  ;;  %v1235_v27 = vrot.slane %v5207_v0, %v1234_v9 }
 0x77e   :  { %1724 = vmatpush1.bf16.msra.mxu0 %v3350_v28  ;;  %v1267_v28 = vrot.slane %v5195_v57, %v1234_v9 }
 0x77f   :  { %3632 = vmatprep.subr.bf16.mxu0 %v4240_v29  ;;  %3661 = vmatpush3.bf16.msra.mxu1 %v4259_v30 }
 0x780   :  { %3662 = vmatprep.subr.bf16.mxu1 %v4261_v37 }
 0x781   :  { %3360 = vmatmul.mubr.msk.bf16.vlgmr.msra.gmra.mrb[40].mxu0 %vm74_vm0, %v5018_v43  ;;  %v4265_v43 = vld [vmem:[%s5607_s14 + $0xe8] sm:$0xff]  }
 0x782   :  { %3633 = vmatpush3.bf16.msra.mxu0 %v4241_v6 }
 0x783   :  { %3634 = vmatprep.subr.bf16.mxu0 %v4242_v23  ;;  %3663 = vmatpush3.bf16.msra.mxu1 %v4263_v41  ;;  %v1242_v41 = vsub.s32 5, %v5180_v50 }
 0x784   :  { %3664 = vmatprep.subr.bf16.mxu1 %v4265_v43 }
 0x786   :  { %3635 = vmatpush3.bf16.msra.mxu0 %v4243_v13 }
 0x787   :  { %3636 = vmatprep.subr.bf16.mxu0 %v4244_v21  ;;  %3665 = vmatpush3.bf16.msra.mxu1 %v4267_v47  ;;  %v4273_v47 = vld [vmem:[%s5607_s14 + $0x148] sm:$0xff]  }
 0x788   :  { %3666 = vmatprep.subr.bf16.mxu1 %v4268_v49 }
 0x78a   :  { %3637 = vmatpush3.bf16.msra.mxu0 %v4246_v31 }
 0x78b   :  { %3638 = vmatprep.subr.bf16.mxu0 %v4248_v32  ;;  %3667 = vmatpush3.bf16.msra.mxu1 %v4270_v51 }
 0x78c   :  { %3668 = vmatprep.subr.bf16.mxu1 %v4272_v52 }
 0x78e   :  { %3639 = vmatpush3.bf16.msra.mxu0 %v4250_v24 }
 0x78f   :  { %3640 = vmatprep.subr.bf16.mxu0 %v4252_v33  ;;  %3669 = vmatpush3.bf16.msra.mxu1 %v4274_v55 }
 0x790   :  { %3698 = vmatprep.subr.bf16.mxu1 %v4277_v62 }
 0x792   :  { %3641 = vmatpush3.bf16.msra.mxu0 %v4254_v25  ;;  %v1238_v25 = vsub.s32 4, %v5180_v50  ;;  %v4296_v50 = vld [vmem:[%s5607_s14 + $0x178] sm:$0xff]  }
 0x793   :  { %3642 = vmatprep.subr.bf16.mxu0 %v4256_v34 }
 0x796   :  { %3643 = vmatpush3.bf16.msra.mxu0 %v4258_v35 }
 0x797   :  { %3644 = vmatprep.subr.bf16.mxu0 %v4260_v36 }
 0x79a   :  { %3645 = vmatpush3.bf16.msra.mxu0 %v4262_v40  ;;  %v4271_v40 = vld [vmem:[%s5607_s14 + $0x100] sm:$0xff]  }
 0x79b   :  { %3646 = vmatprep.subr.bf16.mxu0 %v4264_v39 }
 0x79e   :  { %3647 = vmatpush3.bf16.msra.mxu0 %v4266_v45 }
 0x79f   :  { %3676 = vmatprep.subr.bf16.mxu0 %v4269_v46 }
 0x834   :  { %v1497_v56 = vpop.f32.mrb[24].mxu0  ;;  %v1626_v61 = vpop.f32.mrb[20].mxu1 }
 0x835   :  { %v1498_v58 = vadd.f32 %v1497_v56, %v1223_v5  ;;  %v1627_v11 = vadd.f32 %v1626_v61, %v1247_v48  ;;  %v1499_v59 = vpop.f32.mrb[25].mxu0  ;;  %v1628_v12 = vpop.f32.mrb[21].mxu1  ;;  %v1243_v56 = vrot.slane %v5207_v0, %v1242_v41  ;;  %v1283_v61 = vrot.slane %v5195_v57, %v1250_v4 }
 0x836   :  { %v1500_v1 = vadd.f32 %v1499_v59, %v1227_v53  ;;  %v1629_v14 = vadd.f32 %v1628_v12, %v1251_v7  ;;  %v1501_v15 = vpop.f32.mrb[26].mxu0  ;;  %v1630_v17 = vpop.f32.mrb[22].mxu1  ;;  %v4276_v12 = vld [vmem:[%s5607_s14 + $0x150] sm:$0xff]  }
 0x837   :  { %v1502_v19 = vadd.f32 %v1501_v15, %v1223_v5  ;;  %v1631_v20 = vadd.f32 %v1630_v17, %v1247_v48  ;;  %v1503_v22 = vpop.f32.mrb[27].mxu0  ;;  %v1632_v16 = vpop.f32.mrb[23].mxu1  ;;  %v1807_v29 = vmax.f32 %v1498_v58, 0.0  ;;  %v1813_v30 = vmax.f32 %v1627_v11, 0.0 }
 0x838   :  { %v1504_v3 = vadd.f32 %v1503_v22, %v1227_v53  ;;  %v1633_v26 = vadd.f32 %v1632_v16, %v1251_v7  ;;  %v1808_v13 = vmax.f32 %v1500_v1, 0.0  ;;  %v1814_v21 = vmax.f32 %v1629_v14, 0.0 }
 0x839   :  { %v1823_v6 = vmax.f32 %v1502_v19, 0.0  ;;  %v1829_v23 = vmax.f32 %v1631_v20, 0.0  ;;  %v1239_v48 = vrot.slane %v5207_v0, %v1238_v25 }
 0x83a   :  { %v1824_v31 = vmax.f32 %v1504_v3, 0.0  ;;  %v1830_v32 = vmax.f32 %v1633_v26, 0.0 }
 0x83b   :  { %v1839_v24 = vpack.c.bf16 %v1823_v6, %v1807_v29  ;;  %v5227_v33 = vpack.c.bf16 %v1829_v23, %v1813_v30  ;;  %v4280_v29 = vld [vmem:[%s5607_s14 + $0x158] sm:$0xff]  }
 0x83c   :  { %v1840_v34 = vpack.c.bf16 %v1824_v31, %v1808_v13  ;;  %v5230_v35 = vpack.c.bf16 %v1830_v32, %v1814_v21  ;;  %v1540_v36 = vpop.f32.mrb[28].mxu0  ;;  %v1712_v37 = vpop.f32.mrb[24].mxu1  ;;  %v4281_v21 = vld [vmem:[%s5607_s14 + $0x1c8] sm:$0xff]  }
 0x83d   :  { %v1541_v39 = vadd.f32 %v1540_v36, %v1231_v10  ;;  %v1713_v43 = vadd.f32 %v1712_v37, %v1263_v18  ;;  %v1542_v44 = vpop.f32.mrb[29].mxu0  ;;  %v1714_v45 = vpop.f32.mrb[25].mxu1  ;;  %v1255_v36 = vrot.slane %v5195_v57, %v1222_v63 }
 0x83e   :  { %v1543_v49 = vadd.f32 %v1542_v44, %v1235_v27  ;;  %v1715_v46 = vadd.f32 %v1714_v45, %v1267_v28  ;;  %v1544_v51 = vpop.f32.mrb[30].mxu0  ;;  %v1716_v52 = vpop.f32.mrb[26].mxu1  ;;  %2918 = vmatprep.mubr.bf16.mxu0 %v1840_v34 }
 0x83f   :  { %v1545_v54 = vadd.f32 %v1544_v51, %v1231_v10  ;;  %v1717_v55 = vadd.f32 %v1716_v52, %v1263_v18  ;;  %v1546_v62 = vpop.f32.mrb[31].mxu0  ;;  %v1718_v5 = vpop.f32.mrb[27].mxu1  ;;  %2919 = vmatmul.mubr.bf16.vlgmr.msra.gmra.mrb[44].mxu0 %v1839_v24  ;;  %v1809_v9 = vmax.f32 %v1541_v39, 0.0  ;;  %v1817_v58 = vmax.f32 %v1713_v43, 0.0  ;;  %v4278_v10 = vld [vmem:[%s5607_s14 + $0x110] sm:$0xff]   ;;  %v4279_v18 = vld [vmem:[%s5607_s14 + $0x180] sm:$0xff]  }
 0x840   :  { %v1547_v53 = vadd.f32 %v1546_v62, %v1235_v27  ;;  %v1719_v7 = vadd.f32 %v1718_v5, %v1267_v28  ;;  %3677 = vmatpush3.bf16.msra.mxu0 %v4271_v40  ;;  %v1810_v1 = vmax.f32 %v1543_v49, 0.0  ;;  %v1818_v14 = vmax.f32 %v1715_v46, 0.0  ;;  %v4282_v39 = vld [vmem:[%s5607_s14 + $0x118] sm:$0xff]   ;;  %v4283_v43 = vld [vmem:[%s5607_s14 + $0x188] sm:$0xff]   ;;  %v4284_v49 = vld [vmem:[%s5607_s14 + $0x160] sm:$0xff]  }
 0x841   :  { %v1825_v11 = vmax.f32 %v1545_v54, 0.0  ;;  %v1833_v59 = vmax.f32 %v1717_v55, 0.0  ;;  %3678 = vmatprep.subr.bf16.mxu0 %v4273_v47  ;;  %v4285_v46 = vld [vmem:[%s5607_s14 + $0x1d0] sm:$0xff]  }
 0x842   :  { %v1826_v15 = vmax.f32 %v1547_v53, 0.0  ;;  %v1834_v17 = vmax.f32 %v1719_v7, 0.0  ;;  %v4286_v53 = vld [vmem:[%s5607_s14 + $0x120] sm:$0xff]   ;;  %v4287_v7 = vld [vmem:[%s5607_s14 + $0x190] sm:$0xff]  }
 0x843   :  { %v1841_v19 = vpack.c.bf16 %v1825_v11, %v1809_v9  ;;  %v5254_v20 = vpack.c.bf16 %v1833_v59, %v1817_v58  ;;  %v4289_v9 = vld [vmem:[%s5607_s14 + $0x1d8] sm:$0xff]  }
 0x844   :  { %v1842_v0 = vpack.c.bf16 %v1826_v15, %v1810_v1  ;;  %v5256_v22 = vpack.c.bf16 %v1834_v17, %v1818_v14  ;;  %3679 = vmatpush3.bf16.msra.mxu0 %v4275_v8  ;;  %v1583_v4 = vpop.f32.mrb[32].mxu0  ;;  %v1798_v16 = vpop.f32.mrb[28].mxu1  ;;  %v4290_v14 = vld [vmem:[%s5607_s14 + $0x128] sm:$0xff]   ;;  %v4291_v15 = vld [vmem:[%s5607_s14 + $0x198] sm:$0xff]  }
 0x845   :  { %v1584_v3 = vadd.f32 %v1583_v4, %v1239_v48  ;;  %v1799_v26 = vadd.f32 %v1798_v16, %v5198_v60  ;;  %v1585_v27 = vpop.f32.mrb[33].mxu0  ;;  %v1800_v28 = vpop.f32.mrb[29].mxu1  ;;  %3680 = vmatprep.subr.bf16.mxu0 %v4276_v12  ;;  %v4292_v4 = vld [vmem:[%s5607_s14 + $0x170] sm:$0xff]   ;;  %v4293_v16 = vld [vmem:[%s5607_s14 + $0x1e0] sm:$0xff]  }
 0x846   :  { %v1586_v30 = vadd.f32 %v1585_v27, %v1243_v56  ;;  %v1801_v6 = vadd.f32 %v1800_v28, %v1283_v61  ;;  %v1587_v23 = vpop.f32.mrb[34].mxu0  ;;  %v1802_v13 = vpop.f32.mrb[30].mxu1  ;;  %2959 = vmatprep.mubr.bf16.mxu1 %v1842_v0  ;;  %v1271_v0 = vrot.slane %v5195_v57, %v1238_v25  ;;  %v4294_v28 = vld [vmem:[%s5607_s14 + $0x130] sm:$0xff]  }
 0x847   :  { %v1588_v31 = vadd.f32 %v1587_v23, %v1239_v48  ;;  %v1803_v32 = vadd.f32 %v1802_v13, %v5198_v60  ;;  %v1589_v24 = vpop.f32.mrb[35].mxu0  ;;  %v1804_v34 = vpop.f32.mrb[31].mxu1  ;;  %2960 = vmatmul.mubr.bf16.vlgmr.msra.gmra.mrb[32].mxu1 %v1841_v19  ;;  %v1259_v60 = vrot.slane %v5195_v57, %v1226_v2  ;;  %v1811_v44 = vmax.f32 %v1584_v3, 0.0 }
 0x848   :  { %v1590_v37 = vadd.f32 %v1589_v24, %v1243_v56  ;;  %v1805_v40 = vadd.f32 %v1804_v34, %v1283_v61  ;;  %3681 = vmatpush3.bf16.msra.mxu0 %v4278_v10  ;;  %3699 = vmatpush3.bf16.msra.mxu1 %v4279_v18  ;;  %v1821_v45 = vmax.f32 %v1799_v26, 0.0  ;;  %v1812_v51 = vmax.f32 %v1586_v30, 0.0  ;;  %v4288_v61 = vld [vmem:[%s5607_s14 + $0x168] sm:$0xff]  }
 0x849   :  { %v1827_v47 = vmax.f32 %v1588_v31, 0.0  ;;  %v1837_v63 = vmax.f32 %v1803_v32, 0.0  ;;  %3041 = vmatprep.mubr.bf16.mxu1 %v5230_v35  ;;  %3682 = vmatprep.subr.bf16.mxu0 %v4280_v29  ;;  %v1822_v52 = vmax.f32 %v1801_v6, 0.0  ;;  %v1275_v3 = vrot.slane %v5195_v57, %v1242_v41  ;;  %v4295_v29 = vld [vmem:[%s5607_s14 + $0x1a0] sm:$0xff]   ;;  %v4297_v57 = vld [vmem:[%s5607_s14 + $0x1e8] sm:$0xff]   ;;  %v4298_v32 = vld [vmem:[%s5607_s14 + $0x138] sm:$0xff]  }
 0x84a   :  { %v1828_v54 = vmax.f32 %v1590_v37, 0.0  ;;  %v1838_v55 = vmax.f32 %v1805_v40, 0.0  ;;  %3700 = vmatprep.subr.bf16.mxu1 %v4281_v21  ;;  %v4299_v24 = vld [vmem:[%s5607_s14 + $0x1a8] sm:$0xff]   ;;  %v4300_v37 = vld [vmem:[%s5607_s14 + $0x1f0] sm:$0xff]   ;;  %v4301_v40 = vld [vmem:[%s5607_s14 + $0x240] sm:$0xff]  }
 0x84b   :  { %v5291_v2 = vpack.c.bf16 %v1827_v47, %v1811_v44  ;;  %v5293_v62 = vpack.c.bf16 %v1837_v63, %v1821_v45  ;;  %v4302_v45 = vld [vmem:[%s5607_s14 + $0x1b0] sm:$0xff]   ;;  %v4303_v47 = vld [vmem:[%s5607_s14 + $0x200] sm:$0xff]   ;;  %v4304_v63 = vld [vmem:[%s5607_s14 + $0x1f8] sm:$0xff]  }
 0x84c   :  { %v1844_v5 = vpack.c.bf16 %v1828_v54, %v1812_v51  ;;  %v5295_v35 = vpack.c.bf16 %v1838_v55, %v1822_v52  ;;  %3683 = vmatpush3.bf16.msra.mxu0 %v4282_v39  ;;  %3701 = vmatpush3.bf16.msra.mxu1 %v4283_v43  ;;  %v1669_v48 = vpop.f32.mrb[36].mxu0  ;;  %v4307_v51 = vld [vmem:[%s5607_s14 + $0x208] sm:$0xff]   ;;  %v4308_v52 = vld [vmem:[%s5607_s14 + $0x250] sm:$0xff]   ;;  %v4309_v54 = vld [vmem:[%s5607_s14 + $0x2c0] sm:$0xff]  }
 0x84d   :  { %v1670_v8 = vadd.f32 %v1669_v48, %v1255_v36  ;;  %v1671_v56 = vpop.f32.mrb[37].mxu0  ;;  %3684 = vmatprep.subr.bf16.mxu0 %v4284_v49  ;;  %3702 = vmatprep.subr.bf16.mxu1 %v4285_v46  ;;  %v4305_v49 = vld [vmem:[%s5607_s14 + $0x248] sm:$0xff]   ;;  %v4306_v46 = vld [vmem:[%s5607_s14 + $0x1b8] sm:$0xff]   ;;  %v4310_v55 = vld [vmem:[%s5607_s14 + $0x210] sm:$0xff]  }
 0x84e   :  { %v1672_v58 = vadd.f32 %v1671_v56, %v1259_v60  ;;  %v1673_v11 = vpop.f32.mrb[38].mxu0  ;;  %3000 = vmatprep.mubr.bf16.mxu0 %v1844_v5  ;;  %v4312_v5 = vld [vmem:[%s5607_s14 + $0x258] sm:$0xff]   ;;  %v4313_v48 = vld [vmem:[%s5607_s14 + $0x2c8] sm:$0xff]   ;;  %v4318_v56 = vld [vmem:[%s5607_s14 + $0x220] sm:$0xff]  }
 0x84f   :  { %v1674_v59 = vadd.f32 %v1673_v11, %v1255_v36  ;;  %v1675_v12 = vpop.f32.mrb[39].mxu0  ;;  %v1815_v17 = vmax.f32 %v1670_v8, 0.0  ;;  %v4316_v8 = vld [vmem:[%s5607_s14 + $0x260] sm:$0xff]   ;;  %v4323_v11 = vld [vmem:[%s5607_s14 + $0x298] sm:$0xff]  }
 0x850   :  { %v1676_v1 = vadd.f32 %v1675_v12, %v1259_v60  ;;  %3685 = vmatpush3.bf16.msra.mxu0 %v4286_v53  ;;  %3703 = vmatpush3.bf16.msra.mxu1 %v4287_v7  ;;  %v1816_v10 = vmax.f32 %v1672_v58, 0.0  ;;  %v4314_v53 = vld [vmem:[%s5607_s14 + $0x218] sm:$0xff]   ;;  %v4315_v7 = vld [vmem:[%s5607_s14 + $0x288] sm:$0xff]   ;;  %v4325_v12 = vld [vmem:[%s5607_s14 + $0x2e0] sm:$0xff]  }
 0x851   :  { %v1831_v19 = vmax.f32 %v1674_v59, 0.0  ;;  %3686 = vmatprep.subr.bf16.mxu0 %v4288_v61  ;;  %3704 = vmatprep.subr.bf16.mxu1 %v4289_v9  ;;  %v4320_v61 = vld [vmem:[%s5607_s14 + $0x268] sm:$0xff]   ;;  %v4321_v9 = vld [vmem:[%s5607_s14 + $0x2d8] sm:$0xff]   ;;  %v4324_v59 = vld [vmem:[%s5607_s14 + $0x270] sm:$0xff]  }
 0x852   :  { %v1832_v18 = vmax.f32 %v1676_v1, 0.0  ;;  %v4322_v58 = vld [vmem:[%s5607_s14 + $0x228] sm:$0xff]   ;;  %v4326_v1 = vld [vmem:[%s5607_s14 + $0x230] sm:$0xff]  }
 0x853   :  { %v5327_v26 = vpack.c.bf16 %v1831_v19, %v1815_v17  ;;  %v4329_v17 = vld [vmem:[%s5607_s14 + $0x2e8] sm:$0xff]   ;;  %v4330_v19 = vld [vmem:[%s5607_s14 + $0x238] sm:$0xff]  }
 0x854   :  { %v1848_v27 = vpack.c.bf16 %v1832_v18, %v1816_v10  ;;  %3687 = vmatpush3.bf16.msra.mxu0 %v4290_v14  ;;  %3705 = vmatpush3.bf16.msra.mxu1 %v4291_v15  ;;  %v1755_v25 = vpop.f32.mrb[40].mxu0  ;;  %v4327_v14 = vld [vmem:[%s5607_s14 + $0x2a0] sm:$0xff]   ;;  %v4328_v15 = vld [vmem:[%s5607_s14 + $0x278] sm:$0xff]   ;;  %v4334_v10 = vld [vmem:[%s5607_s14 + $0x2b0] sm:$0xff]  }
 0x855   :  { %v1756_v30 = vadd.f32 %v1755_v25, %v1271_v0  ;;  %v1757_v6 = vpop.f32.mrb[41].mxu0  ;;  %3688 = vmatprep.subr.bf16.mxu0 %v4292_v4  ;;  %3706 = vmatprep.subr.bf16.mxu1 %v4293_v16  ;;  %v4332_v4 = vld [vmem:[%s5607_s14 + $0x2f0] sm:$0xff]   ;;  %v4333_v16 = vld [vmem:[%s5607_s14 + $0x340] sm:$0xff]   ;;  %v4338_v25 = vld [vmem:[%s5607_s14 + $0x2b8] sm:$0xff]  }
 0x856   :  { %v1758_v41 = vadd.f32 %v1757_v6, %v1275_v3  ;;  %v1759_v23 = vpop.f32.mrb[42].mxu0  ;;  %v4335_v18 = vld [vmem:[%s5607_s14 + $0x300] sm:$0xff]  }
 0x857   :  { %v1760_v13 = vadd.f32 %v1759_v23, %v1271_v0  ;;  %v1761_v21 = vpop.f32.mrb[43].mxu0  ;;  %v1819_v34 = vmax.f32 %v1756_v30, 0.0  ;;  %v4331_v0 = vld [vmem:[%s5607_s14 + $0x2a8] sm:$0xff]   ;;  %v4342_v30 = vld [vmem:[%s5607_s14 + $0x310] sm:$0xff]   ;;  %v4343_v6 = vld [vmem:[%s5607_s14 + $0x380] sm:$0xff]  }
 0x858   :  { %v1762_v31 = vadd.f32 %v1761_v21, %v1275_v3  ;;  %3689 = vmatpush3.bf16.msra.mxu0 %v4294_v28  ;;  %3707 = vmatpush3.bf16.msra.mxu1 %v4295_v29  ;;  %v1820_v39 = vmax.f32 %v1758_v41, 0.0  ;;  %v4336_v3 = vld [vmem:[%s5607_s14 + $0x2f8] sm:$0xff]   ;;  %v4339_v28 = vld [vmem:[%s5607_s14 + $0x308] sm:$0xff]   ;;  %v4340_v29 = vld [vmem:[%s5607_s14 + $0x350] sm:$0xff]  }
 0x859   :  { %v1835_v36 = vmax.f32 %v1760_v13, 0.0  ;;  %3690 = vmatprep.subr.bf16.mxu0 %v4296_v50  ;;  %3708 = vmatprep.subr.bf16.mxu1 %v4297_v57  ;;  %v4344_v50 = vld [vmem:[%s5607_s14 + $0x358] sm:$0xff]   ;;  %v4345_v57 = vld [vmem:[%s5607_s14 + $0x3c8] sm:$0xff]   ;;  %v4348_v13 = vld [vmem:[%s5607_s14 + $0x360] sm:$0xff]  }
 0x85a   :  { %v1836_v43 = vmax.f32 %v1762_v31, 0.0  ;;  %v4346_v41 = vld [vmem:[%s5607_s14 + $0x318] sm:$0xff]   ;;  %v4347_v23 = vld [vmem:[%s5607_s14 + $0x388] sm:$0xff]   ;;  %v4350_v21 = vld [vmem:[%s5607_s14 + $0x320] sm:$0xff]  }
 0x85b   :  { %v5353_v60 = vpack.c.bf16 %v1835_v36, %v1819_v34  ;;  %v4352_v31 = vld [vmem:[%s5607_s14 + $0x368] sm:$0xff]   ;;  %v4355_v34 = vld [vmem:[%s5607_s14 + $0x398] sm:$0xff]   ;;  %v4356_v36 = vld [vmem:[%s5607_s14 + $0x370] sm:$0xff]  }
 0x85c   :  { %v5355_v44 = vpack.c.bf16 %v1836_v43, %v1820_v39  ;;  %3691 = vmatpush3.bf16.msra.mxu0 %v4298_v32  ;;  %3709 = vmatpush3.bf16.msra.mxu1 %v4299_v24  ;;  %v4353_v32 = vld [vmem:[%s5607_s14 + $0x3d8] sm:$0xff]   ;;  %v4354_v24 = vld [vmem:[%s5607_s14 + $0x328] sm:$0xff]   ;;  %v4359_v39 = vld [vmem:[%s5607_s14 + $0x3a0] sm:$0xff]  }
 0x85d   :  { %3710 = vmatprep.subr.bf16.mxu1 %v4300_v37  ;;  %3720 = vmatprep.subr.bf16.mxu0 %v4301_v40  ;;  %v4357_v37 = vld [vmem:[%s5607_s14 + $0x3e0] sm:$0xff]   ;;  %v4358_v40 = vld [vmem:[%s5607_s14 + $0x330] sm:$0xff]   ;;  %v4360_v43 = vld [vmem:[%s5607_s14 + $0x378] sm:$0xff]  }
 0x85f   :  { %3001 = vmatmul.mubr.bf16.vlgmr.msra.gmra.mrb[48].mxu0 %v5291_v2  ;;  %v4311_v2 = vld [vmem:[%s5607_s14 + $0x280] sm:$0xff]  }
 0x860   :  { %3711 = vmatpush3.bf16.msra.mxu1 %v4302_v45  ;;  %3721 = vmatpush3.bf16.msra.mxu0 %v4303_v47  ;;  %v4362_v45 = vld [vmem:[%s5607_s14 + $0x338] sm:$0xff]   ;;  %v4363_v47 = vld [vmem:[%s5607_s14 + $0x3a8] sm:$0xff]  }
 0x861   :  { %3082 = vmatprep.mubr.bf16.mxu0 %v1848_v27  ;;  %3712 = vmatprep.subr.bf16.mxu1 %v4304_v63  ;;  %v4337_v27 = vld [vmem:[%s5607_s14 + $0x348] sm:$0xff]   ;;  %v4364_v63 = vld [vmem:[%s5607_s14 + $0x3f0] sm:$0xff]  }
 0x862   :  { %3722 = vmatprep.subr.bf16.mxu0 %v4305_v49  ;;  %v4365_v49 = vld [vmem:[%s5607_s14 + $0x3b0] sm:$0xff]  }
 0x864   :  { %3713 = vmatpush3.bf16.msra.mxu1 %v4306_v46  ;;  %3723 = vmatpush3.bf16.msra.mxu0 %v4307_v51  ;;  %v4366_v46 = vld [vmem:[%s5607_s14 + $0x3f8] sm:$0xff]  }
 0x865   :  { %3724 = vmatprep.subr.bf16.mxu0 %v4308_v52  ;;  %3742 = vmatprep.subr.bf16.mxu1 %v4309_v54  ;;  %v4367_v51 = vld [vmem:[%s5607_s14 + $0x3b8] sm:$0xff]  }
 0x867   :  { %3042 = vmatmul.mubr.bf16.vlgmr.msra.gmra.mrb[36].mxu1 %v5227_v33  ;;  %v4317_v33 = vld [vmem:[%s5607_s14 + $0x2d0] sm:$0xff]  }
 0x868   :  { %3725 = vmatpush3.bf16.msra.mxu0 %v4310_v55  ;;  %3743 = vmatpush3.bf16.msra.mxu1 %v4311_v2 }
 0x869   :  { %3123 = vmatprep.mubr.bf16.mxu1 %v5256_v22  ;;  %3726 = vmatprep.subr.bf16.mxu0 %v4312_v5  ;;  %v4319_v22 = vld [vmem:[%s5607_s14 + $0x290] sm:$0xff]  }
 0x86a   :  { %3744 = vmatprep.subr.bf16.mxu1 %v4313_v48 }
 0x86c   :  { %3727 = vmatpush3.bf16.msra.mxu0 %v4314_v53  ;;  %3745 = vmatpush3.bf16.msra.mxu1 %v4315_v7  ;;  %v3362_v53 = vld [vmem:[%s5608_s15] ss:$0 sm:$0xff] }
 0x86d   :  { %3728 = vmatprep.subr.bf16.mxu0 %v4316_v8  ;;  %3746 = vmatprep.subr.bf16.mxu1 %v4317_v33 }
 0x870   :  { %3729 = vmatpush3.bf16.msra.mxu0 %v4318_v56  ;;  %3747 = vmatpush3.bf16.msra.mxu1 %v4319_v22 }
 0x871   :  { %3730 = vmatprep.subr.bf16.mxu0 %v4320_v61  ;;  %3748 = vmatprep.subr.bf16.mxu1 %v4321_v9 }
 0x874   :  { %3731 = vmatpush3.bf16.msra.mxu0 %v4322_v58  ;;  %3749 = vmatpush3.bf16.msra.mxu1 %v4323_v11 }
 0x875   :  { %3732 = vmatprep.subr.bf16.mxu0 %v4324_v59  ;;  %3750 = vmatprep.subr.bf16.mxu1 %v4325_v12 }
 0x878   :  { %3733 = vmatpush3.bf16.msra.mxu0 %v4326_v1  ;;  %3751 = vmatpush3.bf16.msra.mxu1 %v4327_v14 }
 0x879   :  { %3734 = vmatprep.subr.bf16.mxu0 %v4328_v15  ;;  %3752 = vmatprep.subr.bf16.mxu1 %v4329_v17 }
 0x87c   :  { %3735 = vmatpush3.bf16.msra.mxu0 %v4330_v19  ;;  %3753 = vmatpush3.bf16.msra.mxu1 %v4331_v0 }
 0x87d   :  { %3754 = vmatprep.subr.bf16.mxu1 %v4332_v4  ;;  %3764 = vmatprep.subr.bf16.mxu0 %v4333_v16 }
 0x87f   :  { %3083 = vmatmul.mubr.bf16.vlgmr.msra.gmra.mrb[52].mxu0 %v5327_v26  ;;  %v4341_v26 = vld [vmem:[%s5607_s14 + $0x3c0] sm:$0xff]  }
 0x880   :  { %3755 = vmatpush3.bf16.msra.mxu1 %v4334_v10  ;;  %3765 = vmatpush3.bf16.msra.mxu0 %v4335_v18 }
 0x881   :  { %3164 = vmatprep.mubr.bf16.mxu0 %v5355_v44  ;;  %3756 = vmatprep.subr.bf16.mxu1 %v4336_v3  ;;  %v4361_v44 = vld [vmem:[%s5607_s14 + $0x3e8] sm:$0xff]  }
 0x882   :  { %3766 = vmatprep.subr.bf16.mxu0 %v4337_v27 }
 0x884   :  { %3757 = vmatpush3.bf16.msra.mxu1 %v4338_v25  ;;  %3767 = vmatpush3.bf16.msra.mxu0 %v4339_v28 }
 0x885   :  { %3768 = vmatprep.subr.bf16.mxu0 %v4340_v29  ;;  %3786 = vmatprep.subr.bf16.mxu1 %v4341_v26 }
 0x887   :  { %3124 = vmatmul.mubr.bf16.vlgmr.msra.gmra.mrb[40].mxu1 %v5254_v20  ;;  %v4349_v20 = vld [vmem:[%s5607_s14 + $0x3d0] sm:$0xff]  }
 0x888   :  { %3769 = vmatpush3.bf16.msra.mxu0 %v4342_v30  ;;  %3787 = vmatpush3.bf16.msra.mxu1 %v4343_v6 }
 0x889   :  { %3205 = vmatprep.mubr.bf16.mxu1 %v5295_v35  ;;  %3770 = vmatprep.subr.bf16.mxu0 %v4344_v50  ;;  %v4351_v35 = vld [vmem:[%s5607_s14 + $0x390] sm:$0xff]  }
 0x88a   :  { %3788 = vmatprep.subr.bf16.mxu1 %v4345_v57 }
 0x88c   :  { %3771 = vmatpush3.bf16.msra.mxu0 %v4346_v41  ;;  %3789 = vmatpush3.bf16.msra.mxu1 %v4347_v23 }
 0x88d   :  { %3772 = vmatprep.subr.bf16.mxu0 %v4348_v13  ;;  %3790 = vmatprep.subr.bf16.mxu1 %v4349_v20 }
 0x890   :  { %3773 = vmatpush3.bf16.msra.mxu0 %v4350_v21  ;;  %3791 = vmatpush3.bf16.msra.mxu1 %v4351_v35 }
 0x891   :  { %3774 = vmatprep.subr.bf16.mxu0 %v4352_v31  ;;  %3792 = vmatprep.subr.bf16.mxu1 %v4353_v32 }
 0x894   :  { %3775 = vmatpush3.bf16.msra.mxu0 %v4354_v24  ;;  %3793 = vmatpush3.bf16.msra.mxu1 %v4355_v34 }
 0x895   :  { %3776 = vmatprep.subr.bf16.mxu0 %v4356_v36  ;;  %3794 = vmatprep.subr.bf16.mxu1 %v4357_v37 }
 0x898   :  { %3777 = vmatpush3.bf16.msra.mxu0 %v4358_v40  ;;  %3795 = vmatpush3.bf16.msra.mxu1 %v4359_v39 }
 0x899   :  { %3778 = vmatprep.subr.bf16.mxu0 %v4360_v43  ;;  %3796 = vmatprep.subr.bf16.mxu1 %v4361_v44 }
 0x89c   :  { %3779 = vmatpush3.bf16.msra.mxu0 %v4362_v45  ;;  %3797 = vmatpush3.bf16.msra.mxu1 %v4363_v47 }
 0x89d   :  { %3798 = vmatprep.subr.bf16.mxu1 %v4364_v63 }
 0x89f   :  { %3165 = vmatmul.mubr.bf16.vlgmr.msra.gmra.mrb[56].mxu0 %v5353_v60 }
 0x8a0   :  { %3799 = vmatpush3.bf16.msra.mxu1 %v4365_v49 }
 0x8a1   :  { %3800 = vmatprep.subr.bf16.mxu1 %v4366_v46 }
 0x8a4   :  { %3801 = vmatpush3.bf16.msra.mxu1 %v4367_v51 }
 0x8a7   :  { %3206 = vmatmul.mubr.bf16.vlgmr.msra.gmra.mrb[44].mxu1 %v5293_v62 }
 0x912   :  { %v3648_v52 = vpop.f32.mrb[44].mxu0 }
 0x913   :  { %v3649_v54 = vpop.f32.mrb[45].mxu0 }
 0x914   :  { %v3650_v55 = vadd.f32 %v3649_v54, %v3648_v52  ;;  %v3651_v2 = vpop.f32.mrb[46].mxu0 }
 0x915   :  { %v3652_v5 = vpop.f32.mrb[47].mxu0 }
 0x916   :  { %v3653_v48 = vadd.f32 %v3652_v5, %v3651_v2  ;;  %v2921_v8 = vadd.f32 %v3650_v55, %v3362_v53 }
 0x918   :  { %v2924_v61 = vadd.f32 %v3653_v48, %v3362_v53 }
 0x91a   :  { %v3670_v60 = vpop.f32.mrb[32].mxu1 }
 0x91b   :  { %v3671_v7 = vpop.f32.mrb[33].mxu1 }
 0x91c   :  { %v3672_v33 = vadd.f32 %v3671_v7, %v3670_v60  ;;  %v3673_v56 = vpop.f32.mrb[34].mxu1 }
 0x91d   :  { %v3674_v22 = vpop.f32.mrb[35].mxu1 }
 0x91e   :  { %v2962_v9 = vadd.f32 %v3672_v33, %v2921_v8  ;;  %v3675_v58 = vadd.f32 %v3674_v22, %v3673_v56 }
 0x920   :  { %v2965_v62 = vadd.f32 %v3675_v58, %v2924_v61 }
 0x932   :  { %v3692_v11 = vpop.f32.mrb[48].mxu0 }
 0x933   :  { %v3693_v59 = vpop.f32.mrb[49].mxu0 }
 0x934   :  { %v3694_v12 = vadd.f32 %v3693_v59, %v3692_v11  ;;  %v3695_v1 = vpop.f32.mrb[50].mxu0 }
 0x935   :  { %v3696_v14 = vpop.f32.mrb[51].mxu0 }
 0x936   :  { %v3003_v15 = vadd.f32 %v3694_v12, %v2962_v9  ;;  %v3697_v17 = vadd.f32 %v3696_v14, %v3695_v1 }
 0x938   :  { %v3006_v19 = vadd.f32 %v3697_v17, %v2965_v62 }
 0x93a   :  { %v3714_v0 = vpop.f32.mrb[36].mxu1 }
 0x93b   :  { %v3715_v4 = vpop.f32.mrb[37].mxu1 }
 0x93c   :  { %v3716_v16 = vadd.f32 %v3715_v4, %v3714_v0  ;;  %v3717_v10 = vpop.f32.mrb[38].mxu1  ;;  %v3492_v0 = vld [vmem:[%s5610_s17] ss:$0 sm:$0xff] }
 0x93d   :  { %v3718_v18 = vpop.f32.mrb[39].mxu1 }
 0x93e   :  { %v3044_v3 = vadd.f32 %v3716_v16, %v3003_v15  ;;  %v3719_v27 = vadd.f32 %v3718_v18, %v3717_v10  ;;  %v3491_v15 = vld [vmem:[%s5609_s16] ss:$0 sm:$0xff] }
 0x940   :  { %v3047_v25 = vadd.f32 %v3719_v27, %v3006_v19 }
 0x952   :  { %v3736_v28 = vpop.f32.mrb[52].mxu0 }
 0x953   :  { %v3737_v29 = vpop.f32.mrb[53].mxu0 }
 0x954   :  { %v3738_v26 = vadd.f32 %v3737_v29, %v3736_v28  ;;  %v3739_v30 = vpop.f32.mrb[54].mxu0 }
 0x955   :  { %v3740_v6 = vpop.f32.mrb[55].mxu0 }
 0x956   :  { %v3085_v50 = vadd.f32 %v3738_v26, %v3044_v3  ;;  %v3741_v57 = vadd.f32 %v3740_v6, %v3739_v30 }
 0x958   :  { %v3088_v41 = vadd.f32 %v3741_v57, %v3047_v25 }
 0x95a   :  { %v3758_v23 = vpop.f32.mrb[40].mxu1 }
 0x95b   :  { %v3759_v13 = vpop.f32.mrb[41].mxu1 }
 0x95c   :  { %v3760_v20 = vadd.f32 %v3759_v13, %v3758_v23  ;;  %v3761_v21 = vpop.f32.mrb[42].mxu1 }
 0x95d   :  { %v3762_v35 = vpop.f32.mrb[43].mxu1 }
 0x95e   :  { %v3126_v31 = vadd.f32 %v3760_v20, %v3085_v50  ;;  %v3763_v32 = vadd.f32 %v3762_v35, %v3761_v21 }
 0x960   :  { %v3129_v24 = vadd.f32 %v3763_v32, %v3088_v41 }
 0x972   :  { %v3780_v34 = vpop.f32.mrb[56].mxu0 }
 0x973   :  { %v3781_v36 = vpop.f32.mrb[57].mxu0 }
 0x974   :  { %v3782_v37 = vadd.f32 %v3781_v36, %v3780_v34  ;;  %v3783_v40 = vpop.f32.mrb[58].mxu0 }
 0x975   :  { %v3784_v39 = vpop.f32.mrb[59].mxu0 }
 0x976   :  { %v3167_v43 = vadd.f32 %v3782_v37, %v3126_v31  ;;  %v3785_v44 = vadd.f32 %v3784_v39, %v3783_v40 }
 0x978   :  { %v3170_v45 = vadd.f32 %v3785_v44, %v3129_v24 }
 0x97a   :  { %v3802_v47 = vpop.f32.mrb[44].mxu1 }
 0x97b   :  { %v3803_v63 = vpop.f32.mrb[45].mxu1 }
 0x97c   :  { %v3804_v49 = vadd.f32 %v3803_v63, %v3802_v47  ;;  %v3805_v46 = vpop.f32.mrb[46].mxu1 }
 0x97d   :  { %v3806_v51 = vpop.f32.mrb[47].mxu1 }
 0x97e   :  { %v3208_v52 = vadd.f32 %v3804_v49, %v3167_v43  ;;  %v3807_v54 = vadd.f32 %v3806_v51, %v3805_v46 }
 0x980   :  { %v3211_v55 = vadd.f32 %v3807_v54, %v3170_v45  ;;  %v3214_v2 = vadd.f32 %v3208_v52, %v5014_v42 }
 0x982   :  { %v3218_v5 = vsel %vm74_vm0, %v3214_v2, 0.0  ;;  %v3215_v48 = vadd.f32 %v3211_v55, %v5003_v38 }
 0x983   :  { %3219 = vadd.xlane.f32.xlu0 %v3218_v5 }
 0x984   :  { %v3221_v53 = vsel %vm74_vm0, %v3215_v48, 0.0 }
 0x985   :  { %3222 = vadd.xlane.f32.xlu1 %v3221_v53 }
 0xa10   :  { %v3220_v60 = vpop.xlane.xlu0 %3219 }
 0xa11   :  { %v3224_v7 = vmul.f32 0.03125, %v3220_v60 }
 0xa12   :  { %v3223_v8 = vpop.xlane.xlu1 %3222 }
 0xa13   :  { %v3226_v33 = vsub.f32 %v3214_v2, %v3224_v7  ;;  %v3225_v56 = vmul.f32 0.03125, %v3223_v8 }
 0xa15   :  { %v3227_v22 = vsub.f32 %v3215_v48, %v3225_v56  ;;  %v3228_v61 = vmul.f32 %v3226_v33, %v3226_v33 }
 0xa17   :  { %v3230_v9 = vsel %vm74_vm0, %v3228_v61, 0.0  ;;  %v3229_v58 = vmul.f32 %v3227_v22, %v3227_v22 }
 0xa18   :  { %3231 = vadd.xlane.f32.xlu0 %v3230_v9 }
 0xa19   :  { %v3233_v42 = vsel %vm74_vm0, %v3229_v58, 0.0 }
 0xa1a   :  { %3234 = vadd.xlane.f32.xlu1 %v3233_v42 }
 0xaa5   :  { %v3232_v62 = vpop.xlane.xlu0 %3231 }
 0xaa6   :  { %v3236_v38 = vmul.f32 0.03125, %v3232_v62 }
 0xaa7   :  { %v3235_v11 = vpop.xlane.xlu1 %3234 }
 0xaa8   :  { %v3238_v59 = vadd.f32 1e-05, %v3236_v38  ;;  %v3237_v12 = vmul.f32 0.03125, %v3235_v11 }
 0xaaa   :  { %4436 = vrsqrt.f32 %v3238_v59  ;;  %v3239_v1 = vadd.f32 1e-05, %v3237_v12 }
 0xaac   :  { %4438 = vrsqrt.f32 %v3239_v1 }
 0xab4   :  { %v4437_v14 = vpop.eup %4436 }
 0xab5   :  { %v3242_v17 = vmul.f32 %v4437_v14, %v3226_v33 }
 0xab6   :  { %v4439_v19 = vpop.eup %4438 }
 0xab7   :  { %v3243_v4 = vmul.f32 %v4439_v19, %v3227_v22  ;;  %v3250_v16 = vmul.f32 %v3491_v15, %v3242_v17 }
 0xab9   :  { %v3251_v10 = vmul.f32 %v3491_v15, %v3243_v4  ;;  %v3258_v18 = vadd.f32 %v3492_v0, %v3250_v16 }
 0xabb   :  { %v3259_v3 = vadd.f32 %v3492_v0, %v3251_v10  ;;  %3260 = vst.msk [vmem:[#allocation2] sm:$0xff] %vm74_vm0, %v3258_v18 }
 0xabd   :  { %3261 = vst.msk [vmem:[#allocation2 + $0x8] sm:$0xff] %vm74_vm0, %v3259_v3 }
 0xabe   :  { %4453 = shalt.err (!%p4450_p4)
}
 0xabf   :  { %s4454_s24 = scalar_lea.hbm %s5611_s18, 256 }
 0xac0   :  { %p4455_p5 = scmp.ne.s32.totalorder %s5611_s18, %s4454_s24  ;;  %p4458_p6 = scmp.lt.u32.totalorder %s4454_s24, %s5611_s18 }
 0xac2   :  { %p4460_p7 = pnand %p4458_p6, %p4455_p5 }
 0xac4   :  { %4463 = shalt.err (!%p4460_p7)
}
 0xac5   :  { %s4475_s12 = smov 128   ;;  %s4476_s23 = smov 8  }
 0xac6   :  { %3273 = dma.vmem_to_hbm [thread:$0]  %s3268_s7, 256, %s5611_s18, [#allocation3], %s4475_s12, %s4475_s12, %s4476_s23  }
 0xac7   :  { %4464 = dma.done.wait [#allocation3], 256  }
 0xac8   :  { %4465 = vsyncadd [#allocation3], 4294967040 }
 0xac9   :  { %3277 = vsyncpa [#allocation3], 1 }

</bundles_post_ra>
